<compile_context>
chip_gen: v7x
topology: tpu7x:2x2x1
jax: 0.10.0
libtpu: 0.0.40
codegen_flags: <defaults>
</compile_context>

<pallas_src>
import jax
import jax.numpy as jnp
from jax import lax
from jax.experimental import pallas as pl
from jax.experimental.pallas import tpu as pltpu


_TD_TARGET = 8192                 # reduction-tile target (multiple of 128)
_TB_TARGET = 256                  # batch-tile target (multiple of 8)
_VMEM_LIMIT = 48 * 1024 * 1024    # fits v7x 64 MiB physical VMEM, > v5e default
_SMALL_BYTES = 1 << 20            # below this, plain XLA dot beats a pallas launch


def _linear_kernel(x_ref, w_ref, o_ref):
    # x_ref: (TB, TD)  w_ref: (TD, O)  o_ref: (TB, O) f32
    # o_ref's block index is constant across the reduction axis, so it stays
    # VMEM-resident and is written back to HBM only once per batch tile.
    k = pl.program_id(1)

    @pl.when(k == 0)
    def _():
        o_ref[...] = jnp.zeros_like(o_ref)

    o_ref[...] += jnp.dot(
        x_ref[...],
        w_ref[...],
        preferred_element_type=jnp.float32,
        precision=lax.Precision.HIGHEST,
    )


def _pick_batch_tile(b):
    """Batch tile: full B when tiny; otherwise a multiple of 8 that guarantees
    at least two batch tiles (so the 'parallel' axis splits across v7x's two
    TensorCores) and never exceeds _TB_TARGET. Partial final tiles are safe."""
    if b < 16:
        return b                              # equals full dim -> layout-legal
    return max(8, min(_TB_TARGET, 8 * (b // 16)))


def _pick_lane_tile(d):
    """Reduction tile + padded D. The tile must cover D exactly (padding the
    reduction with anything but zeros would corrupt the accumulation), so we
    either find a dividing multiple of 128 or zero-pad D in the wrapper."""
    if d <= _TD_TARGET:
        return d, d                           # single K step, tile == full dim
    td = _TD_TARGET
    while td >= 1024:
        if d % td == 0:
            return td, d                      # dividing tile, no padding needed
        td -= 128
    td = _TD_TARGET
    return td, pl.cdiv(d, td) * td            # zero-pad D up to a multiple of td


def _block_spec(shape, index_map, buffers=None):
    """BlockSpec with optional deeper pipelining; falls back cleanly if the
    pipeline_mode kwarg / pl.Buffered is unavailable in this JAX version."""
    if buffers is not None:
        try:
            return pl.BlockSpec(shape, index_map, pipeline_mode=pl.Buffered(buffers))
        except (AttributeError, TypeError):
            pass
    return pl.BlockSpec(shape, index_map)


def _linear_pallas(x2d, w_t):
    """x2d: (B, D) f32, w_t: (D, out_dim) f32 -> (B, out_dim) f32."""
    B, D = x2d.shape
    out_dim = w_t.shape[1]

    tb = _pick_batch_tile(B)
    td, d_pad = _pick_lane_tile(D)

    if d_pad != D:
        # Zero-padding the reduction axis is exact (zero columns add nothing).
        x2d = jnp.pad(x2d, ((0, 0), (0, d_pad - D)))
        w_t = jnp.pad(w_t, ((0, d_pad - D), (0, 0)))

    grid_b = pl.cdiv(B, tb)
    grid_k = d_pad // td
    grid = (grid_b, grid_k)

    itemsize = jnp.dtype(x2d.dtype).itemsize
    cost = pl.CostEstimate(
        flops=2 * B * D * out_dim,
        transcendentals=0,
        # weight is re-read once per batch tile when the reduction is tiled
        bytes_accessed=(B * D + D * out_dim * grid_b + B * out_dim) * itemsize,
    )

    x_spec = _block_spec(
        (tb, td),
        lambda i, k: (i, k),
        buffers=3 if grid_k >= 4 else None,   # pure-DMA pipeline: deepen on long K
    )
    w_spec = pl.BlockSpec((td, out_dim), lambda i, k: (k, 0))
    o_spec = pl.BlockSpec((tb, out_dim), lambda i, k: (i, 0))

    return pl.pallas_call(
        _linear_kernel,
        out_shape=jax.ShapeDtypeStruct((B, out_dim), jnp.float32),
        grid_spec=pltpu.PrefetchScalarGridSpec(
            num_scalar_prefetch=0,
            grid=grid,
            in_specs=[x_spec, w_spec],
            out_specs=o_spec,
        ),
        compiler_params=pltpu.CompilerParams(
            dimension_semantics=("parallel", "arbitrary"),
            vmem_limit_bytes=_VMEM_LIMIT,
        ),
        cost_estimate=cost,
    )(x2d, w_t)


def arch_test_forward(x, m_fc, fin_feature=None, *, use_pallas=None):
    """JAX/Pallas equivalent of ArchTest.forward.

    x:     (B, 1, S, S, S) float32 (any trailing shape whose product is D)
    m_fc:  (out_dim, D)    float32
    returns (B, out_dim), or ((B, out_dim), (B, D)) if fin_feature is not None.
    """
    B = x.shape[0]
    feature_flattened = x.reshape(B, -1)
    D = feature_flattened.shape[1]

    # Pre-transpose the weight once (free wrapper-side layout plumbing) so the
    # kernel is a plain MXU-friendly x @ W^T matmul.
    w_t = m_fc.T  # (D, out_dim)

    if use_pallas is None:
        use_pallas = (B * D * jnp.dtype(feature_flattened.dtype).itemsize) >= _SMALL_BYTES

    if use_pallas:
        output = _linear_pallas(feature_flattened, w_t)
    else:
        # Tiny-problem fast path: pallas launch overhead would dominate.
        output = jnp.dot(
            feature_flattened, w_t,
            preferred_element_type=jnp.float32,
            precision=lax.Precision.HIGHEST,
        )

    if fin_feature is None:
        return output
    return output, feature_flattened


if __name__ == "__main__":
    key = jax.random.PRNGKey(0)
    k1, k2, k3, k4 = jax.random.split(key, 4)

    # ---- Test 1: canonical tiny shape (input_size=8 -> D=512, batch=2) -----
    batch, s = 2, 8
    D = s ** 3
    x = jax.random.normal(k1, (batch, 1, s, s, s), dtype=jnp.float32)
    # m_fc = randn(2, input_size**3) * 0.01  (deterministic synthetic init)
    m_fc = jax.random.normal(k2, (2, D), dtype=jnp.float32) * 0.01

    out = arch_test_forward(x, m_fc, use_pallas=True)      # force Pallas path
    out = jax.block_until_ready(out)
    ref = jnp.dot(x.reshape(batch, -1), m_fc.T, precision=lax.Precision.HIGHEST)
    assert out.shape == (batch, 2)
    assert jnp.allclose(out, ref, atol=1e-4, rtol=1e-4)

    out2, feat = arch_test_forward(x, m_fc, fin_feature=True, use_pallas=True)
    jax.block_until_ready((out2, feat))
    assert feat.shape == (batch, D)
    assert jnp.allclose(out2, ref, atol=1e-4, rtol=1e-4)

    # Auto path (tiny problem -> XLA fast path) must agree as well.
    out3 = jax.block_until_ready(arch_test_forward(x, m_fc))
    assert jnp.allclose(out3, ref, atol=1e-4, rtol=1e-4)

    # ---- Test 2: multi-tile path (batch split across TCs + K-streamed) -----
    batch2, s2 = 16, 32                    # D = 32768 -> 4 reduction steps of 8192
    D2 = s2 ** 3
    x2 = jax.random.normal(k3, (batch2, 1, s2, s2, s2), dtype=jnp.float32)
    m_fc2 = jax.random.normal(k4, (2, D2), dtype=jnp.float32) * 0.01

    out_big = jax.block_until_ready(arch_test_forward(x2, m_fc2, use_pallas=True))
    ref_big = jnp.dot(x2.reshape(batch2, -1), m_fc2.T, precision=lax.Precision.HIGHEST)
    assert out_big.shape == (batch2, 2)
    assert jnp.allclose(out_big, ref_big, atol=1e-3, rtol=1e-3)

    # TODO(synk): self.convtest (Conv3d(1,1,1)) is declared in __init__ but never
    # used in forward, so it is intentionally not implemented here.
    print("KERNEL_OK")
</pallas_src>

<mosaic_0001>
module attributes {stable_mosaic.version = 11 : i64} {
  func.func @_linear_kernel(%arg0: i32, %arg1: i32, %arg2: memref<2x512xf32, #tpu.memory_space<vmem>>, %arg3: memref<512x2xf32, #tpu.memory_space<vmem>>, %arg4: memref<2x2xf32, #tpu.memory_space<vmem>>) attributes {dimension_semantics = [#tpu.dimension_semantics<parallel>, #tpu.dimension_semantics<arbitrary>], iteration_bounds = array<i64: 1, 1>, scalar_prefetch = 0 : i64, scratch_operands = 0 : i64, tpu.core_type = #tpu.core_type<tc>, window_params = [{transform_indices = @transform_0, window_bounds = array<i64: 2, 512>}, {transform_indices = @transform_1, window_bounds = array<i64: 512, 2>}, {transform_indices = @transform_2, window_bounds = array<i64: 2, 2>}]} {
    %c0_i32 = arith.constant 0 : i32
    %0 = arith.cmpi eq, %arg1, %c0_i32 : i32
    %1 = arith.extui %0 : i1 to i32
    %c0_i32_0 = arith.constant 0 : i32
    %2 = arith.cmpi ne, %1, %c0_i32_0 : i32
    scf.if %2 {
      %cst_8 = arith.constant 0.000000e+00 : f32
      %9 = vector.broadcast %cst_8 : f32 to vector<2x2xf32>
      %c0_9 = arith.constant 0 : index
      %c0_10 = arith.constant 0 : index
      %10 = vector.load %arg4[%c0_9, %c0_10] : memref<2x2xf32, #tpu.memory_space<vmem>>, vector<2x2xf32>
      tpu.vector_store %arg4[%c0_9, %c0_10], %9 {strides = array<i32>} : memref<2x2xf32, #tpu.memory_space<vmem>>, vector<2x2xf32>,
    } else {
    }
    %c0 = arith.constant 0 : index
    %c0_1 = arith.constant 0 : index
    %3 = vector.load %arg4[%c0, %c0_1] : memref<2x2xf32, #tpu.memory_space<vmem>>, vector<2x2xf32>
    %c0_2 = arith.constant 0 : index
    %c0_3 = arith.constant 0 : index
    %4 = vector.load %arg2[%c0_2, %c0_3] : memref<2x512xf32, #tpu.memory_space<vmem>>, vector<2x512xf32>
    %c0_4 = arith.constant 0 : index
    %c0_5 = arith.constant 0 : index
    %5 = vector.load %arg3[%c0_4, %c0_5] : memref<512x2xf32, #tpu.memory_space<vmem>>, vector<512x2xf32>
    %cst = arith.constant dense<0.000000e+00> : vector<2x2xf32>
    %6 = tpu.matmul %4, %5, %cst {dimension_numbers = #tpu.dot_dimension_numbers<[1], [0], [0], [1], [0, 0, 1, 1], [], []>, precision = #tpu.contract_precision<fp32>} : vector<2x512xf32>, vector<512x2xf32>, vector<2x2xf32> -> vector<2x2xf32>
    %7 = arith.addf %3, %6 : vector<2x2xf32>
    %c0_6 = arith.constant 0 : index
    %c0_7 = arith.constant 0 : index
    %8 = vector.load %arg4[%c0_6, %c0_7] : memref<2x2xf32, #tpu.memory_space<vmem>>, vector<2x2xf32>
    tpu.vector_store %arg4[%c0_6, %c0_7], %7 {strides = array<i32>} : memref<2x2xf32, #tpu.memory_space<vmem>>, vector<2x2xf32>,
    return
  }
  func.func @transform_0(%arg0: i32, %arg1: i32) -> (i32, i32) {
    %c0_i32 = arith.constant 0 : i32
    return %arg0, %arg1 : i32, i32
  }
  func.func @transform_1(%arg0: i32, %arg1: i32) -> (i32, i32) {
    %c0_i32 = arith.constant 0 : i32
    %c0_i32_0 = arith.constant 0 : i32
    return %arg1, %c0_i32 : i32, i32
  }
  func.func @transform_2(%arg0: i32, %arg1: i32) -> (i32, i32) {
    %c0_i32 = arith.constant 0 : i32
    %c0_i32_0 = arith.constant 0 : i32
    return %arg0, %c0_i32 : i32, i32
  }
}

</mosaic_0001>

<bundles_post_ra>
// kernel: tpu_custom_call.1
= control target key start
LH: loop header
LB: loop body
LE: loop exit
PB: predicated region body
PF: predicated region fallthrough
CT: control target
= control target key end

     0   :  { %v2679_v29 = vmov 1983009808   ;;  %s4062_s0 = inlined_call_operand.vmem [shape: f32[2,512], index: 0, kind: input, shape index: {}]   ;;  %s4063_s1 = inlined_call_operand.vmem [shape: f32[512,2], index: 1, kind: input, shape index: {}]   ;;  %s4064_s2 = inlined_call_operand.hbm [shape: f32[2,2], index: 2, kind: output, shape index: {}]  }
   0x1   :  { %v36_v0 = vld [vmem:[%s4063_s1 + $0x80] sm:$0xff]  ;;  %v37_v1 = vld [vmem:[%s4063_s1 + $0x88] sm:$0xff]  ;;  %v38_v7 = vld [vmem:[%s4063_s1 + $0x90] sm:$0xff]  ;;  %v2750_v30 = vunpack.c.l.s4 %v2679_v29 }
   0x2   :  { %v20_v2 = vld [vmem:[%s4063_s1] sm:$0xff]  ;;  %v155_v3 = vand.u32 4294901760, %v36_v0  ;;  %v158_v4 = vand.u32 4294901760, %v37_v1  ;;  %v21_v5 = vld [vmem:[%s4063_s1 + $0x8] sm:$0xff]  ;;  %v39_v8 = vld [vmem:[%s4063_s1 + $0x98] sm:$0xff]  ;;  %v161_v10 = vand.u32 4294901760, %v38_v7 }
   0x3   :  { %v107_v6 = vand.u32 4294901760, %v20_v2  ;;  %v110_v9 = vand.u32 4294901760, %v21_v5  ;;  %v164_v11 = vand.u32 4294901760, %v39_v8  ;;  %v22_v12 = vld [vmem:[%s4063_s1 + $0x10] sm:$0xff]  ;;  %v23_v13 = vld [vmem:[%s4063_s1 + $0x18] sm:$0xff]  ;;  %v40_v18 = vld [vmem:[%s4063_s1 + $0xa0] sm:$0xff] }
   0x4   :  { %v2721_v14 = vpack.c.bf16 %v158_v4, %v155_v3  ;;  %v113_v16 = vand.u32 4294901760, %v22_v12  ;;  %v116_v17 = vand.u32 4294901760, %v23_v13  ;;  %v41_v19 = vld [vmem:[%s4063_s1 + $0xa8] sm:$0xff]  ;;  %v24_v23 = vld [vmem:[%s4063_s1 + $0x20] sm:$0xff]  ;;  %v2744_v26 = vsub.f32 %v38_v7, %v161_v10  ;;  %v42_v39 = vld [vmem:[%s4063_s1 + $0xb0] sm:$0xff] }
   0x5   :  { %v2723_v15 = vsub.f32 %v20_v2, %v107_v6  ;;  %v2731_v20 = vpack.c.bf16 %v110_v9, %v107_v6  ;;  %v2733_v21 = vsub.f32 %v21_v5, %v110_v9  ;;  %v2735_v22 = vpack.c.bf16 %v164_v11, %v161_v10  ;;  %v25_v24 = vld [vmem:[%s4063_s1 + $0x28] sm:$0xff]  ;;  %v43_v44 = vld [vmem:[%s4063_s1 + $0xb8] sm:$0xff]  ;;  %v26_v57 = vld [vmem:[%s4063_s1 + $0x30] sm:$0xff] }
   0x6   :  { %2268 = vmatprep.subr.bf16.mxu0 %v2721_v14  ;;  %v2746_v27 = vsub.f32 %v39_v8, %v164_v11  ;;  %v2748_v28 = vpack.c.bf16 %v116_v17, %v113_v16  ;;  %v167_v31 = vand.u32 4294901760, %v40_v18  ;;  %v170_v32 = vand.u32 4294901760, %v41_v19  ;;  %v27_v58 = vld [vmem:[%s4063_s1 + $0x38] sm:$0xff]  ;;  %v44_v7 = vld [vmem:[%s4063_s1 + $0xc0] sm:$0xff]  ;;  %v45_v8 = vld [vmem:[%s4063_s1 + $0xc8] sm:$0xff] }
   0x7   :  { %2270 = vmatpush3.bf16.msra.mxu0 %v2731_v20  ;;  %v2753_v33 = vsub.f32 %v36_v0, %v155_v3  ;;  %v2755_v34 = vsub.f32 %v37_v1, %v158_v4  ;;  %v119_v35 = vand.u32 4294901760, %v24_v23  ;;  %v122_v36 = vand.u32 4294901760, %v25_v24 }
   0x8   :  { %2272 = vmatprep.subr.bf16.mxu0 %v2735_v22  ;;  %v4080_v37 = vand.u32 4294901760, %v2723_v15  ;;  %v4079_v38 = vand.u32 4294901760, %v2733_v21  ;;  %v2763_v40 = vsub.f32 %v22_v12, %v113_v16  ;;  %v2765_v41 = vsub.f32 %v23_v13, %v116_v17  ;;  %v28_v13 = vld [vmem:[%s4063_s1 + $0x40] sm:$0xff] }
   0x9   :  { %v2767_v42 = vpack.c.bf16 %v170_v32, %v167_v31  ;;  %v4083_v43 = vand.u32 4294901760, %v2753_v33  ;;  %v2773_v45 = vsub.f32 %v40_v18, %v167_v31  ;;  %v2775_v46 = vsub.f32 %v41_v19, %v170_v32  ;;  %v29_v32 = vld [vmem:[%s4063_s1 + $0x48] sm:$0xff] }
   0xa   :  { %v4081_v47 = vand.u32 4294901760, %v2755_v34  ;;  %v2778_v48 = vpack.c.bf16 %v122_v36, %v119_v35  ;;  %v222_v50 = vsub.f32 %v2723_v15, %v4080_v37  ;;  %v229_v51 = vsub.f32 %v2733_v21, %v4079_v38 }
   0xb   :  { %2274 = vmatpush3.bf16.msra.mxu0 %v2748_v28  ;;  %v334_v49 = vsub.f32 %v2753_v33, %v4083_v43  ;;  %v173_v52 = vand.u32 4294901760, %v42_v39  ;;  %v176_v54 = vand.u32 4294901760, %v43_v44  ;;  %v4076_v55 = vand.u32 4294901760, %v2744_v26 }
   0xc   :  { %2276 = vmatprep.subr.bf16.mxu0 %v2767_v42  ;;  %v341_v53 = vsub.f32 %v2755_v34, %v4081_v47  ;;  %v4074_v56 = vand.u32 4294901760, %v2746_v27  ;;  %v2802_v60 = vsub.f32 %v24_v23, %v119_v35  ;;  %v223_v61 = vand.u32 4294901760, %v222_v50 }
   0xd   :  { %v335_v59 = vand.u32 4294901760, %v334_v49  ;;  %v230_v62 = vand.u32 4294901760, %v229_v51  ;;  %v2804_v0 = vsub.f32 %v25_v24, %v122_v36  ;;  %v2806_v1 = vpack.c.bf16 %v176_v54, %v173_v52 }
   0xe   :  { %v342_v63 = vand.u32 4294901760, %v341_v53  ;;  %v348_v2 = vsub.f32 %v2744_v26, %v4076_v55  ;;  %v355_v4 = vsub.f32 %v2746_v27, %v4074_v56  ;;  %v125_v5 = vand.u32 4294901760, %v26_v57 }
   0xf   :  { %2278 = vmatpush3.bf16.msra.mxu0 %v2778_v48  ;;  %v2301_v3 = vpack.c.bf16 %v230_v62, %v223_v61  ;;  %v128_v6 = vand.u32 4294901760, %v27_v58  ;;  %v4073_v11 = vand.u32 4294901760, %v2763_v40  ;;  %v4071_v12 = vand.u32 4294901760, %v2765_v41  ;;  %v47_v62 = vld [vmem:[%s4063_s1 + $0xd8] sm:$0xff] }
  0x10   :  { %v2299_v9 = vpack.c.bf16 %v342_v63, %v335_v59  ;;  %2280 = vmatprep.subr.bf16.mxu0 %v2806_v1  ;;  %v349_v10 = vand.u32 4294901760, %v348_v2  ;;  %v2827_v16 = vsub.f32 %v42_v39, %v173_v52  ;;  %v2829_v17 = vsub.f32 %v43_v44, %v176_v54 }
  0x11   :  { %v356_v18 = vand.u32 4294901760, %v355_v4  ;;  %v2831_v19 = vpack.c.bf16 %v128_v6, %v125_v5  ;;  %v236_v23 = vsub.f32 %v2763_v40, %v4073_v11  ;;  %v243_v24 = vsub.f32 %v2765_v41, %v4071_v12  ;;  %v30_v4 = vld [vmem:[%s4063_s1 + $0x50] sm:$0xff] }
  0x12   :  { %2300 = vmatprep.subr.bf16.mxu1 %v2299_v9  ;;  %v179_v29 = vand.u32 4294901760, %v44_v7  ;;  %v182_v31 = vand.u32 4294901760, %v45_v8  ;;  %v4070_v36 = vand.u32 4294901760, %v2773_v45  ;;  %v4069_v39 = vand.u32 4294901760, %v2775_v46 }
  0x13   :  { %2302 = vmatpush3.bf16.msra.mxu1 %v2301_v3  ;;  %v2303_v35 = vpack.c.bf16 %v356_v18, %v349_v10  ;;  %2282 = vmatpush3.bf16.msra.mxu0 %v2831_v19  ;;  %v131_v44 = vand.u32 4294901760, %v28_v13  ;;  %v2845_v49 = vsub.f32 %v26_v57, %v125_v5  ;;  %v237_v50 = vand.u32 4294901760, %v236_v23  ;;  %v46_v57 = vld [vmem:[%s4063_s1 + $0xd0] sm:$0xff] }
  0x14   :  { %v244_v51 = vand.u32 4294901760, %v243_v24  ;;  %v2847_v52 = vpack.c.bf16 %v182_v31, %v179_v29  ;;  %v2849_v53 = vsub.f32 %v27_v58, %v128_v6  ;;  %v362_v54 = vsub.f32 %v2773_v45, %v4070_v36 }
  0x15   :  { %2304 = vmatprep.subr.bf16.mxu1 %v2303_v35  ;;  %v369_v59 = vsub.f32 %v2775_v46, %v4069_v39  ;;  %v134_v61 = vand.u32 4294901760, %v29_v32  ;;  %v2864_v58 = vsub.f32 %v44_v7, %v179_v29  ;;  %v4066_v2 = vand.u32 4294901760, %v2802_v60 }
  0x16   :  { %v2305_v63 = vpack.c.bf16 %v244_v51, %v237_v50  ;;  %2284 = vmatprep.subr.bf16.mxu0 %v2847_v52  ;;  %v4065_v3 = vand.u32 4294901760, %v2804_v0  ;;  %v2871_v5 = vsub.f32 %v45_v8, %v182_v31  ;;  %v363_v6 = vand.u32 4294901760, %v362_v54 }
  0x17   :  { %v370_v9 = vand.u32 4294901760, %v369_v59  ;;  %v2873_v10 = vpack.c.bf16 %v134_v61, %v131_v44 }
  0x18   :  { %7 = vsyncpa [#allocation3], 0  ;;  %2306 = vmatpush3.bf16.msra.mxu1 %v2305_v63  ;;  %v250_v7 = vsub.f32 %v2802_v60, %v4066_v2  ;;  %v257_v18 = vsub.f32 %v2804_v0, %v4065_v3  ;;  %v185_v23 = vand.u32 4294901760, %v46_v57  ;;  %v188_v24 = vand.u32 4294901760, %v47_v62  ;;  %v31_v8 = vld [vmem:[%s4063_s1 + $0x58] sm:$0xff] }
  0x19   :  { %v2307_v29 = vpack.c.bf16 %v370_v9, %v363_v6  ;;  %2286 = vmatpush3.bf16.msra.mxu0 %v2873_v10  ;;  %v4068_v31 = vand.u32 4294901760, %v2827_v16  ;;  %v4067_v35 = vand.u32 4294901760, %v2829_v17  ;;  %v137_v50 = vand.u32 4294901760, %v30_v4 }
  0x1a   :  { %v2887_v51 = vsub.f32 %v28_v13, %v131_v44  ;;  %v251_v54 = vand.u32 4294901760, %v250_v7  ;;  %v258_v59 = vand.u32 4294901760, %v257_v18  ;;  %v2889_v63 = vpack.c.bf16 %v188_v24, %v185_v23  ;;  %v48_v13 = vld [vmem:[%s4063_s1 + $0xe0] sm:$0xff]  ;;  %v49_v44 = vld [vmem:[%s4063_s1 + $0xe8] sm:$0xff] }
  0x1b   :  { %2308 = vmatprep.subr.bf16.mxu1 %v2307_v29  ;;  %v2891_v3 = vsub.f32 %v29_v32, %v134_v61  ;;  %v376_v6 = vsub.f32 %v2827_v16, %v4068_v31  ;;  %v383_v9 = vsub.f32 %v2829_v17, %v4067_v35  ;;  %v140_v2 = vand.u32 4294901760, %v31_v8  ;;  %v32_v29 = vld [vmem:[%s4063_s1 + $0x60] sm:$0xff] }
  0x1c   :  { %v2309_v7 = vpack.c.bf16 %v258_v59, %v251_v54  ;;  %2288 = vmatprep.subr.bf16.mxu0 %v2889_v63  ;;  %v2906_v32 = vsub.f32 %v46_v57, %v185_v23  ;;  %v4072_v61 = vand.u32 4294901760, %v2845_v49  ;;  %v4075_v18 = vand.u32 4294901760, %v2849_v53 }
  0x1d   :  { %v2913_v35 = vsub.f32 %v47_v62, %v188_v24  ;;  %v377_v31 = vand.u32 4294901760, %v376_v6  ;;  %v384_v39 = vand.u32 4294901760, %v383_v9  ;;  %v2915_v36 = vpack.c.bf16 %v140_v2, %v137_v50  ;;  %v33_v62 = vld [vmem:[%s4063_s1 + $0x68] sm:$0xff] }
  0x1e   :  { %2310 = vmatpush3.bf16.msra.mxu1 %v2309_v7  ;;  %v264_v57 = vsub.f32 %v2845_v49, %v4072_v61  ;;  %v271_v23 = vsub.f32 %v2849_v53, %v4075_v18  ;;  %v191_v54 = vand.u32 4294901760, %v48_v13  ;;  %v194_v59 = vand.u32 4294901760, %v49_v44 }
  0x1f   :  { %4166 = vst [vmem:[#allocation5_spill] sm:$0xff] %v2915_v36  ;;  %v2311_v24 = vpack.c.bf16 %v384_v39, %v377_v31  ;;  %2290 = vmatpush3.bf16.msra.mxu0 %v2915_v36  ;;  %v4078_v6 = vand.u32 4294901760, %v2864_v58  ;;  %v4077_v9 = vand.u32 4294901760, %v2871_v5  ;;  %v143_v7 = vand.u32 4294901760, %v32_v29 }
  0x20   :  { %v2929_v12 = vsub.f32 %v30_v4, %v137_v50  ;;  %v265_v61 = vand.u32 4294901760, %v264_v57  ;;  %v272_v11 = vand.u32 4294901760, %v271_v23  ;;  %v2931_v56 = vpack.c.bf16 %v194_v59, %v191_v54  ;;  %v50_v4 = vld [vmem:[%s4063_s1 + $0xf0] sm:$0xff]  ;;  %v51_v50 = vld [vmem:[%s4063_s1 + $0xf8] sm:$0xff] }
  0x21   :  { %2312 = vmatprep.subr.bf16.mxu1 %v2311_v24  ;;  %v2933_v18 = vsub.f32 %v31_v8, %v140_v2  ;;  %v390_v39 = vsub.f32 %v2864_v58, %v4078_v6  ;;  %v397_v31 = vsub.f32 %v2871_v5, %v4077_v9  ;;  %v146_v55 = vand.u32 4294901760, %v33_v62  ;;  %v34_v24 = vld [vmem:[%s4063_s1 + $0x70] sm:$0xff] }
  0x22   :  { %4167 = vst [vmem:[#allocation6_spill] sm:$0xff] %v2931_v56  ;;  %v2313_v57 = vpack.c.bf16 %v272_v11, %v265_v61  ;;  %2292 = vmatprep.subr.bf16.mxu0 %v2931_v56  ;;  %v2948_v2 = vsub.f32 %v48_v13, %v191_v54  ;;  %v4082_v8 = vand.u32 4294901760, %v2887_v51  ;;  %v4084_v23 = vand.u32 4294901760, %v2891_v3 }
  0x23   :  { %v2955_v9 = vsub.f32 %v49_v44, %v194_v59  ;;  %v391_v6 = vand.u32 4294901760, %v390_v39  ;;  %v398_v38 = vand.u32 4294901760, %v397_v31  ;;  %v2957_v37 = vpack.c.bf16 %v146_v55, %v143_v7  ;;  %v35_v44 = vld [vmem:[%s4063_s1 + $0x78] sm:$0xff] }
  0x24   :  { %2314 = vmatpush3.bf16.msra.mxu1 %v2313_v57  ;;  %v278_v11 = vsub.f32 %v2887_v51, %v4082_v8  ;;  %v285_v13 = vsub.f32 %v2891_v3, %v4084_v23  ;;  %v197_v61 = vand.u32 4294901760, %v50_v4  ;;  %v200_v54 = vand.u32 4294901760, %v51_v50 }
  0x25   :  { %4168 = vst [vmem:[#allocation7_spill] sm:$0xff] %v2957_v37  ;;  %v2315_v59 = vpack.c.bf16 %v398_v38, %v391_v6  ;;  %2294 = vmatpush3.bf16.msra.mxu0 %v2957_v37  ;;  %v4089_v39 = vand.u32 4294901760, %v2906_v32  ;;  %v4093_v31 = vand.u32 4294901760, %v2913_v35  ;;  %v149_v57 = vand.u32 4294901760, %v34_v24 }
  0x26   :  { %v2971_v47 = vsub.f32 %v32_v29, %v143_v7  ;;  %v279_v8 = vand.u32 4294901760, %v278_v11  ;;  %v286_v43 = vand.u32 4294901760, %v285_v13  ;;  %v2973_v25 = vpack.c.bf16 %v200_v54, %v197_v61 }
  0x27   :  { %2316 = vmatprep.subr.bf16.mxu1 %v2315_v59  ;;  %v2975_v23 = vsub.f32 %v33_v62, %v146_v55  ;;  %v404_v38 = vsub.f32 %v2906_v32, %v4089_v39  ;;  %v411_v6 = vsub.f32 %v2913_v35, %v4093_v31  ;;  %v152_v37 = vand.u32 4294901760, %v35_v44 }
  0x28   :  { %4169 = vst [vmem:[#allocation8_spill] sm:$0xff] %v2973_v25  ;;  %v2317_v56 = vpack.c.bf16 %v286_v43, %v279_v8  ;;  %2296 = vmatprep.subr.bf16.mxu0 %v2973_v25  ;;  %v2984_v29 = vsub.f32 %v50_v4, %v197_v61  ;;  %v4091_v7 = vand.u32 4294901760, %v2929_v12  ;;  %v4090_v11 = vand.u32 4294901760, %v2933_v18 }
  0x29   :  { %v2988_v55 = vsub.f32 %v51_v50, %v200_v54  ;;  %v405_v62 = vand.u32 4294901760, %v404_v38  ;;  %v412_v13 = vand.u32 4294901760, %v411_v6  ;;  %v2990_v59 = vpack.c.bf16 %v152_v37, %v149_v57  ;;  %v3008_v6 = vld [vmem:[%s4062_s0] sm:$0xff] }
  0x2a   :  { %4170 = vst [vmem:[#allocation9_spill] sm:$0xff] %v2984_v29  ;;  %2318 = vmatpush3.bf16.msra.mxu1 %v2317_v56  ;;  %v2992_v39 = vsub.f32 %v34_v24, %v149_v57  ;;  %v292_v43 = vsub.f32 %v2929_v12, %v4091_v7  ;;  %v299_v4 = vsub.f32 %v2933_v18, %v4090_v11  ;;  %v88_v8 = vunpack.c.0.s8 %v2750_v30 }
  0x2b   :  { %4171 = vst [vmem:[#allocation10_spill] sm:$0xff] %v2988_v55  ;;  %4172 = vst [vmem:[#allocation11_spill] sm:$0xff] %v2990_v59  ;;  %v2319_v61 = vpack.c.bf16 %v412_v13, %v405_v62  ;;  %2298 = vmatpush3.bf16.msra.mxu0 %v2990_v59  ;;  %v4173_v50 = vlaneseq  ;;  %v4092_v38 = vand.u32 4294901760, %v2948_v2  ;;  %v4094_v56 = vand.u32 4294901760, %v2955_v9 }
  0x2c   :  { %v293_v24 = vand.u32 4294901760, %v292_v43  ;;  %v300_v57 = vand.u32 4294901760, %v299_v4  ;;  %4174 = vst [vmem:[#allocation12_spill] sm:$0xff] %v3008_v6  ;;  %v2331_v11 = vpack.c.bf16 %v2755_v34, %v2753_v33  ;;  %v4095_v30 = vand.u32 4294901760, %v2971_v47 }
  0x2d   :  { %v90_v54 = vshrl.u32 %v4173_v50, 7  ;;  %2320 = vmatprep.subr.bf16.mxu1 %v2319_v61  ;;  %v418_v13 = vsub.f32 %v2948_v2, %v4092_v38  ;;  %v425_v43 = vsub.f32 %v2955_v9, %v4094_v56  ;;  %v4103_v4 = vand.u32 4294901760, %v2975_v23 }
  0x2e   :  { %v3022_v50 = vsub.f32 %v35_v44, %v152_v37  ;;  %v2321_v7 = vpack.c.bf16 %v300_v57, %v293_v24  ;;  %2332 = vmatprep.subr.bf16.mxu0 %v2331_v11  ;;  %v306_v61 = vsub.f32 %v2971_v47, %v4095_v30  ;;  %v438_v11 = vand.u32 4294901760, %v2988_v55 }
  0x2f   :  { %v3013_v62 = vsub.s32 %v88_v8, %v90_v54  ;;  %v431_v8 = vand.u32 4294901760, %v2984_v29  ;;  %v419_v38 = vand.u32 4294901760, %v418_v13  ;;  %v426_v31 = vand.u32 4294901760, %v425_v43 }
  0x30   :  { %v313_v56 = vsub.f32 %v2975_v23, %v4103_v4  ;;  %2322 = vmatpush3.bf16.msra.mxu1 %v2321_v7  ;;  %v307_v37 = vand.u32 4294901760, %v306_v61  ;;  %v319_v13 = vand.u32 4294901760, %v2992_v39  ;;  %v326_v43 = vand.u32 4294901760, %v3022_v50 }
  0x31   :  { %4175 = vst [vmem:[#allocation13_spill] sm:$0xff] %v3013_v62  ;;  %v92_v54 = vrot.slane %v3008_v6, %v3013_v62  ;;  %v432_v44 = vsub.f32 %v2984_v29, %v431_v8  ;;  %v2323_v30 = vpack.c.bf16 %v426_v31, %v419_v38  ;;  %v439_v62 = vsub.f32 %v2988_v55, %v438_v11 }
  0x32   :  { %v314_v59 = vand.u32 4294901760, %v313_v56  ;;  %v320_v29 = vsub.f32 %v2992_v39, %v319_v13  ;;  %v327_v31 = vsub.f32 %v3022_v50, %v326_v43  ;;  %vm16_vm0 = vcmask 9216  }
  0x33   :  { %v100_v24 = vcombine.high %v92_v54, %v92_v54  ;;  %v3035_v57 = vand.u32 4294901760, %v92_v54  ;;  %v433_v25 = vand.u32 4294901760, %v432_v44  ;;  %2324 = vmatprep.subr.bf16.mxu1 %v2323_v30  ;;  %v440_v4 = vand.u32 4294901760, %v439_v62 }
  0x34   :  { %v2325_v61 = vpack.c.bf16 %v314_v59, %v307_v37  ;;  %v321_v55 = vand.u32 4294901760, %v320_v29  ;;  %v328_v36 = vand.u32 4294901760, %v327_v31  ;;  %v2333_v37 = vpack.c.bf16 %v2733_v21, %v2723_v15 }
  0x35   :  { %4176 = vst [vmem:[#allocation14_spill] sm:$0xff] %v3035_v57  ;;  %v3040_v6 = vand.u32 4294901760, %v100_v24  ;;  %v3043_v7 = vsub.f32 %v92_v54, %v3035_v57  ;;  %v2327_v44 = vpack.c.bf16 %v440_v4, %v433_v25  ;;  %v4178_v25 = vand.u32 4294901760, %v2753_v33 }
  0x36   :  { %2326 = vmatpush3.bf16.msra.mxu1 %v2325_v61  ;;  %v2329_v62 = vpack.c.bf16 %v328_v36, %v321_v55  ;;  %v4179_v29 = vand.u32 4294901760, %v2755_v34  ;;  %v4180_v31 = vand.u32 4294901760, %v2723_v15  ;;  %v4182_v55 = vand.u32 4294901760, %v2744_v26 }
  0x37   :  { %4177 = vst [vmem:[#allocation15_spill] sm:$0xff] %v3040_v6  ;;  %v203_v38 = vsub.f32 %v100_v24, %v3040_v6  ;;  %v4108_v56 = vand.u32 4294901760, %v3043_v7  ;;  %443 = vmatprep.mubr.f32.mxu1 %v3040_v6  ;;  %2328 = vmatprep.subr.bf16.mxu1 %v2327_v44  ;;  %v2335_v24 = vpack.c.bf16 %v2746_v27, %v2744_v26  ;;  %v4181_v44 = vand.u32 4294901760, %v2733_v21 }
  0x38   :  { %v3061_v4 = vpack.c.bf16 %v4179_v29, %v4178_v25  ;;  %v4184_v33 = vand.u32 4294901760, %v2763_v40  ;;  %v4185_v34 = vand.u32 4294901760, %v2765_v41  ;;  %v4186_v15 = vand.u32 4294901760, %v2773_v45 }
  0x39   :  { %v204_v30 = vand.u32 4294901760, %v203_v38  ;;  %v211_v59 = vsub.f32 %v3043_v7, %v4108_v56  ;;  %v3067_v36 = vpack.c.bf16 %v4181_v44, %v4180_v31  ;;  %v4183_v56 = vand.u32 4294901760, %v2746_v27 }
  0x3a   :  { %2330 = vmatpush3.bf16.msra.mxu1 %v2329_v62  ;;  %v3080_v62 = vpack.c.bf16 %v4185_v34, %v4184_v33  ;;  %v4187_v21 = vand.u32 4294901760, %v2775_v46  ;;  %v4188_v26 = vand.u32 4294901760, %v2802_v60  ;;  %v4189_v27 = vand.u32 4294901760, %v2804_v0 }
  0x3b   :  { %v205_v54 = vsub.f32 %v203_v38, %v204_v30  ;;  %v212_v61 = vand.u32 4294901760, %v211_v59  ;;  %v3073_v6 = vpack.c.bf16 %v4183_v56, %v4182_v55  ;;  %2364 = vmatprep.subr.bf16.mxu1 %v2721_v14  ;;  %v4192_v29 = vand.u32 4294901760, %v2829_v17 }
  0x3c   :  { %v3086_v25 = vpack.c.bf16 %v4187_v21, %v4186_v15  ;;  %v3092_v56 = vpack.c.bf16 %v4189_v27, %v4188_v26  ;;  %v4193_v44 = vand.u32 4294901760, %v2845_v49  ;;  %v4194_v55 = vand.u32 4294901760, %v2849_v53 }
  0x3d   :  { %v206_v59 = vand.u32 4294901760, %v205_v54  ;;  %v4191_v54 = vand.u32 4294901760, %v2827_v16  ;;  %v4195_v34 = vand.u32 4294901760, %v2864_v58  ;;  %v4196_v15 = vand.u32 4294901760, %v2871_v5  ;;  %445 = vmatmul.mubr.f32.vlgmr.msra.gmra.mrb[0].mxu1 %v3035_v57 }
  0x3e   :  { %4190 = vst [vmem:[#allocation16_spill] sm:$0xff] %v3092_v56  ;;  %v3104_v33 = vpack.c.bf16 %v4194_v55, %v4193_v44  ;;  %v4198_v26 = vand.u32 4294901760, %v2887_v51  ;;  %v4199_v27 = vand.u32 4294901760, %v2891_v3  ;;  %v4203_v55 = vand.u32 4294901760, %v2929_v12  ;;  %2366 = vmatpush3.bf16.msra.mxu1 %v2731_v20  ;;  %687 = vmatprep.mubr.f32.mxu1 %v204_v30  ;;  %v3217_v30 = vld [vmem:[%s4063_s1 + $0x198] sm:$0xff] }
  0x3f   :  { %v3098_v31 = vpack.c.bf16 %v4192_v29, %v4191_v54  ;;  %v3110_v21 = vpack.c.bf16 %v4196_v15, %v4195_v34  ;;  %207 = vmatprep.mubr.f32.mxu0 %v206_v59  ;;  %v4200_v54 = vand.u32 4294901760, %v2906_v32  ;;  %v4201_v29 = vand.u32 4294901760, %v2913_v35  ;;  %2368 = vmatprep.subr.bf16.mxu1 %v2735_v22 }
  0x40   :  { %v3116_v56 = vpack.c.bf16 %v4199_v27, %v4198_v26  ;;  %v4204_v34 = vand.u32 4294901760, %v2933_v18  ;;  %v4206_v26 = vand.u32 4294901760, %v2955_v9  ;;  %213 = vmatmul.mubr.f32.vlgmr.msra.gmra.mrb[0].mxu0 %v212_v61  ;;  %v4207_v59 = vand.u32 4294901760, %v2971_v47 }
  0x41   :  { %4197 = vst [vmem:[#allocation17_spill] sm:$0xff] %v3110_v21  ;;  %v3123_v44 = vpack.c.bf16 %v4201_v29, %v4200_v54  ;;  %v4205_v21 = vand.u32 4294901760, %v2948_v2  ;;  %v4208_v54 = vand.u32 4294901760, %v2975_v23  ;;  %v3144_v57 = vpack.c.bf16 %v438_v11, %v431_v8  ;;  %2334 = vmatpush3.bf16.msra.mxu0 %v2333_v37  ;;  %580 = vmatprep.mubr.f32.mxu0 %v203_v38 }
  0x42   :  { %v3129_v15 = vpack.c.bf16 %v4204_v34, %v4203_v55  ;;  %v2337_v55 = vpack.c.bf16 %v2765_v41, %v2763_v40  ;;  %2336 = vmatprep.subr.bf16.mxu0 %v2335_v24  ;;  %v2339_v61 = vpack.c.bf16 %v2775_v46, %v2773_v45  ;;  %2370 = vmatpush3.bf16.msra.mxu1 %v2748_v28 }
  0x43   :  { %4202 = vst [vmem:[#allocation18_spill] sm:$0xff] %v3123_v44  ;;  %v3135_v27 = vpack.c.bf16 %v4206_v26, %v4205_v21  ;;  %v3142_v29 = vpack.c.bf16 %v4208_v54, %v4207_v59  ;;  %v3146_v44 = vpack.c.bf16 %v326_v43, %v319_v13  ;;  %v2341_v8 = vpack.c.bf16 %v2804_v0, %v2802_v60  ;;  %v3172_v60 = vld [vmem:[%s4063_s1 + $0x180] sm:$0xff]  ;;  %v69_v0 = vld [vmem:[%s4063_s1 + $0x188] sm:$0xff] }
  0x44   :  { %2372 = vmatprep.subr.bf16.mxu1 %v2767_v42  ;;  %v2343_v40 = vpack.c.bf16 %v2829_v17, %v2827_v16  ;;  %v2345_v41 = vpack.c.bf16 %v2849_v53, %v2845_v49  ;;  %v2347_v45 = vpack.c.bf16 %v2871_v5, %v2864_v58  ;;  %v2349_v46 = vpack.c.bf16 %v2891_v3, %v2887_v51  ;;  %v3184_v53 = vld [vmem:[%s4063_s1 + $0x100] sm:$0xff]  ;;  %v3189_v58 = vld [vmem:[%s4063_s1 + $0x108] sm:$0xff] }
  0x45   :  { %2338 = vmatpush3.bf16.msra.mxu0 %v2337_v55  ;;  %v2351_v16 = vpack.c.bf16 %v2913_v35, %v2906_v32  ;;  %v1017_v17 = vand.u32 4294901760, %v3172_v60  ;;  %v1020_v49 = vand.u32 4294901760, %v69_v0  ;;  %v2353_v3 = vpack.c.bf16 %v2933_v18, %v2929_v12  ;;  %v4209_v32 = vld [vmem:[#allocation5_spill] sm:$0xff]  ;;  %v3207_v12 = vld [vmem:[%s4063_s1 + $0x190] sm:$0xff]  ;;  %v4216_v59 = vld [vmem:[#allocation8_spill] sm:$0xff] }
  0x46   :  { %2340 = vmatprep.subr.bf16.mxu0 %v2339_v61  ;;  %2374 = vmatpush3.bf16.msra.mxu1 %v2778_v48  ;;  %v2355_v5 = vpack.c.bf16 %v2955_v9, %v2948_v2  ;;  %v969_v35 = vand.u32 4294901760, %v3184_v53  ;;  %v972_v51 = vand.u32 4294901760, %v3189_v58  ;;  %4210 = vst [vmem:[#allocation5_spill] sm:$0xff] %v3207_v12  ;;  %v2357_v18 = vpack.c.bf16 %v2975_v23, %v2971_v47  ;;  %v4211_v9 = vld [vmem:[#allocation6_spill] sm:$0xff]  ;;  %v4212_v2 = vld [vmem:[#allocation9_spill] sm:$0xff]  ;;  %v4215_v47 = vld [vmem:[#allocation7_spill] sm:$0xff] }
  0x47   :  { %2376 = vmatprep.subr.bf16.mxu1 %v2806_v1  ;;  %v3200_v11 = vsub.f32 %v3172_v60, %v1017_v17  ;;  %v3202_v13 = vsub.f32 %v69_v0, %v1020_v49  ;;  %v4213_v43 = vld [vmem:[#allocation10_spill] sm:$0xff]  ;;  %4214 = vst [vmem:[#allocation6_spill] sm:$0xff] %v3217_v30  ;;  %v4114_v21 = vand.u32 4294901760, %v3207_v12  ;;  %v2361_v26 = vpack.c.bf16 %v3022_v50, %v2992_v39  ;;  %v3241_v61 = vld [vmem:[%s4063_s1 + $0x118] sm:$0xff] }
  0x48   :  { %v2359_v38 = vpack.c.bf16 %v4213_v43, %v4212_v2  ;;  %v3220_v37 = vsub.f32 %v3184_v53, %v969_v35  ;;  %v3223_v24 = vsub.f32 %v3189_v58, %v972_v51  ;;  %v4113_v54 = vand.u32 4294901760, %v3217_v30  ;;  %v3236_v55 = vld [vmem:[%s4063_s1 + $0x110] sm:$0xff]  ;;  %4218 = vst [vmem:[#allocation10_spill] sm:$0xff] %v3241_v61  ;;  %v3256_v50 = vld [vmem:[%s4063_s1 + $0x1a8] sm:$0xff]  ;;  %v4225_v2 = vld [vmem:[#allocation12_spill] sm:$0xff] }
  0x49   :  { %2342 = vmatpush3.bf16.msra.mxu0 %v2341_v8  ;;  %v4116_v23 = vand.u32 4294901760, %v3200_v11  ;;  %v4115_v34 = vand.u32 4294901760, %v3202_v13  ;;  %4217 = vst [vmem:[#allocation9_spill] sm:$0xff] %v3236_v55  ;;  %v3246_v8 = vld [vmem:[%s4063_s1 + $0x1a0] sm:$0xff]  ;;  %v3251_v39 = vsub.f32 %v3207_v12, %v4114_v21  ;;  %4220 = vst [vmem:[#allocation8_spill] sm:$0xff] %v3256_v50  ;;  %v4223_v60 = vld [vmem:[#allocation11_spill] sm:$0xff]  ;;  %v3299_v21 = vpack.c.bf16 %v1020_v49, %v1017_v17 }
  0x4a   :  { %2344 = vmatprep.subr.bf16.mxu0 %v2343_v40  ;;  %2378 = vmatpush3.bf16.msra.mxu1 %v2831_v19  ;;  %4219 = vst [vmem:[#allocation7_spill] sm:$0xff] %v3246_v8  ;;  %v3261_v40 = vld [vmem:[%s4063_s1 + $0x120] sm:$0xff]  ;;  %v4123_v0 = vand.u32 4294901760, %v3236_v55  ;;  %v3282_v58 = vsub.f32 %v3217_v30, %v4113_v54  ;;  %v4226_v54 = vand.u32 4294901760, %v3043_v7 }
  0x4b   :  { %2380 = vmatprep.subr.bf16.mxu1 %v2847_v52  ;;  %4221 = vst [vmem:[#allocation19_spill] sm:$0xff] %v3261_v40  ;;  %v1203_v53 = vsub.f32 %v3202_v13, %v4115_v34  ;;  %v4125_v43 = vand.u32 4294901760, %v3251_v39 }
  0x4c   :  { %v3318_v17 = vsub.f32 %v3236_v55, %v4123_v0 }
  0x4d   :  { %2346 = vmatpush3.bf16.msra.mxu0 %v2345_v41  ;;  %v3266_v41 = vld [vmem:[%s4063_s1 + $0x128] sm:$0xff] }
  0x4e   :  { %2348 = vmatprep.subr.bf16.mxu0 %v2347_v45  ;;  %2382 = vmatpush3.bf16.msra.mxu1 %v2873_v10  ;;  %4222 = vst [vmem:[#allocation20_spill] sm:$0xff] %v3266_v41  ;;  %v4118_v45 = vand.u32 4294901760, %v3220_v37 }
  0x4f   :  { %2384 = vmatprep.subr.bf16.mxu1 %v2889_v63 }
  0x50   :  { %v1084_v34 = vsub.f32 %v3220_v37, %v4118_v45  ;;  %v3324_v45 = vld [vmem:[%s4063_s1 + $0x130] sm:$0xff] }
  0x51   :  { %2350 = vmatpush3.bf16.msra.mxu0 %v2349_v46  ;;  %v4117_v46 = vand.u32 4294901760, %v3223_v24  ;;  %4228 = vst [vmem:[#allocation21_spill] sm:$0xff] %v3324_v45 }
  0x52   :  { %2352 = vmatprep.subr.bf16.mxu0 %v2351_v16  ;;  %2386 = vmatpush3.bf16.msra.mxu1 %v4209_v32  ;;  %v1196_v16 = vsub.f32 %v3200_v11, %v4116_v23 }
  0x53   :  { %2388 = vmatprep.subr.bf16.mxu1 %v4211_v9  ;;  %v1091_v23 = vsub.f32 %v3223_v24, %v4117_v46 }
  0x54   :  { %v1197_v49 = vand.u32 4294901760, %v1196_v16 }
  0x55   :  { %2354 = vmatpush3.bf16.msra.mxu0 %v2353_v3  ;;  %v4120_v3 = vand.u32 4294901760, %v3241_v61  ;;  %v1092_v0 = vand.u32 4294901760, %v1091_v23 }
  0x56   :  { %2356 = vmatprep.subr.bf16.mxu0 %v2355_v5  ;;  %2390 = vmatpush3.bf16.msra.mxu1 %v4215_v47  ;;  %v4119_v5 = vand.u32 4294901760, %v3246_v8 }
  0x57   :  { %2392 = vmatprep.subr.bf16.mxu1 %v4216_v59 }
  0x58   :  { %v3338_v16 = vsub.f32 %v3246_v8, %v4119_v5 }
  0x59   :  { %2358 = vmatpush3.bf16.msra.mxu0 %v2357_v18  ;;  %v3289_v18 = vld [vmem:[%s4063_s1 + $0x1b0] sm:$0xff] }
  0x5a   :  { %2360 = vmatprep.subr.bf16.mxu0 %v2359_v38  ;;  %2394 = vmatpush3.bf16.msra.mxu1 %v4223_v60  ;;  %4224 = vst [vmem:[#allocation11_spill] sm:$0xff] %v3289_v18  ;;  %v4122_v38 = vand.u32 4294901760, %v3261_v40 }
  0x5b   :  { %2428 = vmatprep.subr.bf16.mxu1 %v2721_v14  ;;  %v4121_v14 = vand.u32 4294901760, %v3256_v50 }
  0x5d   :  { %2362 = vmatpush3.bf16.msra.mxu0 %v2361_v26  ;;  %v4124_v26 = vand.u32 4294901760, %v3266_v41  ;;  %691 = vmatmul.mubr.f32.vlgmr.msra.gmra.mrb[2].mxu1 %v4226_v54  ;;  %v1204_v54 = vand.u32 4294901760, %v1203_v53  ;;  %v3384_v53 = vld [vmem:[%s4063_s1 + $0x140] sm:$0xff] }
  0x5e   :  { %2396 = vmatprep.subr.bf16.mxu0 %v3061_v4  ;;  %v3310_v4 = vld [vmem:[%s4063_s1 + $0x1b8] sm:$0xff]  ;;  %2430 = vmatpush3.bf16.msra.mxu1 %v2731_v20  ;;  %v3333_v20 = vsub.f32 %v3241_v61, %v4120_v3  ;;  %4234 = vst [vmem:[#allocation25_spill] sm:$0xff] %v3384_v53  ;;  %v3399_v3 = vld [vmem:[%s4063_s1 + $0x148] sm:$0xff] }
  0x5f   :  { %4227 = vst [vmem:[#allocation12_spill] sm:$0xff] %v3310_v4  ;;  %2432 = vmatprep.subr.bf16.mxu1 %v2735_v22  ;;  %v4231_v22 = vld [vmem:[#allocation15_spill] sm:$0xff]  ;;  %v3361_v5 = vsub.f32 %v3266_v41, %v4124_v26  ;;  %v3378_v26 = vsub.f32 %v3251_v39, %v4125_v43  ;;  %v3387_v46 = vpack.c.bf16 %v1204_v54, %v1197_v49  ;;  %4236 = vst [vmem:[#allocation26_spill] sm:$0xff] %v3399_v3  ;;  %v4246_v54 = vld [vmem:[#allocation13_spill] sm:$0xff] }
  0x60   :  { %583 = vmatmul.mubr.f32.vlgmr.msra.gmra.mrb[2].mxu0 %v3043_v7  ;;  %v3328_v7 = vpack.c.bf16 %v972_v51, %v969_v35  ;;  %v3351_v35 = vsub.f32 %v3256_v50, %v4121_v14  ;;  %v3356_v51 = vsub.f32 %v3261_v40, %v4122_v38  ;;  %v3372_v14 = vld [vmem:[%s4063_s1 + $0x1c8] sm:$0xff]  ;;  %961 = vmatprep.mubr.f32.mxu1 %v4231_v22  ;;  %v1085_v38 = vand.u32 4294901760, %v1084_v34 }
  0x61   :  { %2398 = vmatpush3.bf16.msra.mxu0 %v3067_v36  ;;  %v3344_v36 = vld [vmem:[%s4063_s1 + $0x138] sm:$0xff]  ;;  %857 = vmatprep.mubr.f32.mxu0 %v4231_v22  ;;  %4233 = vst [vmem:[#allocation24_spill] sm:$0xff] %v3372_v14  ;;  %v4235_v22 = vand.u32 4294901760, %v3289_v18  ;;  %v4238_v34 = vand.u32 4294901760, %v3310_v4 }
  0x62   :  { %4229 = vst [vmem:[#allocation22_spill] sm:$0xff] %v3328_v7  ;;  %4230 = vst [vmem:[#allocation23_spill] sm:$0xff] %v3344_v36  ;;  %2400 = vmatprep.subr.bf16.mxu0 %v3073_v6  ;;  %v3367_v6 = vld [vmem:[%s4063_s1 + $0x1c0] sm:$0xff]  ;;  %2434 = vmatpush3.bf16.msra.mxu1 %v2748_v28  ;;  %v4237_v28 = vand.u32 4294901760, %v3282_v58  ;;  %v3420_v41 = vpack.c.bf16 %v1092_v0, %v1085_v38  ;;  %v4257_v38 = vand.u32 4294901760, %v3384_v53  ;;  %v3529_v7 = vld [vmem:[%s4063_s1 + $0x168] sm:$0xff] }
  0x63   :  { %4232 = vst [vmem:[#allocation15_spill] sm:$0xff] %v3367_v6  ;;  %v3392_v23 = vsub.f32 %v3289_v18, %v4235_v22  ;;  %2436 = vmatprep.subr.bf16.mxu1 %v2767_v42  ;;  %v3415_v18 = vsub.f32 %v3310_v4, %v4238_v34  ;;  %v4241_v22 = vand.u32 4294901760, %v3324_v45  ;;  %v4243_v34 = vand.u32 4294901760, %v3344_v36 }
  0x64   :  { %v3406_v49 = vsub.f32 %v3282_v58, %v4237_v28  ;;  %4240 = vst [vmem:[#allocation28_spill] sm:$0xff] %v3420_v41  ;;  %v4244_v28 = vand.u32 4294901760, %v3318_v17  ;;  %v4266_v40 = vand.u32 4294901760, %v3356_v51  ;;  %v3552_v41 = vld [vmem:[%s4063_s1 + $0x170] sm:$0xff] }
  0x65   :  { %2402 = vmatpush3.bf16.msra.mxu0 %v3080_v62  ;;  %4239 = vst [vmem:[#allocation27_spill] sm:$0xff] %v3415_v18  ;;  %v3426_v43 = vsub.f32 %v3324_v45, %v4241_v22  ;;  %v3433_v42 = vsub.f32 %v3344_v36, %v4243_v34  ;;  %v3444_v22 = vld [vmem:[%s4063_s1 + $0x1d0] sm:$0xff]  ;;  %v4247_v34 = vcombine.high %v4225_v2, %v4225_v2  ;;  %v4250_v62 = vand.u32 4294901760, %v3333_v20 }
  0x66   :  { %2404 = vmatprep.subr.bf16.mxu0 %v3086_v25  ;;  %2438 = vmatpush3.bf16.msra.mxu1 %v2778_v48  ;;  %v3438_v0 = vsub.f32 %v3318_v17, %v4244_v28  ;;  %v3449_v48 = vld [vmem:[%s4063_s1 + $0x1d8] sm:$0xff]  ;;  %v4251_v45 = vand.u32 4294901760, %v3367_v6  ;;  %v4252_v2 = vand.u32 4294901760, %v3372_v14  ;;  %v3545_v8 = vsub.f32 %v3356_v51, %v4266_v40 }
  0x67   :  { %4242 = vst [vmem:[#allocation29_spill] sm:$0xff] %v3426_v43  ;;  %4245 = vst [vmem:[#allocation30_spill] sm:$0xff] %v3449_v48  ;;  %v3455_v25 = vrot.slane %v4247_v34, %v4246_v54  ;;  %v4249_v28 = vld [vmem:[#allocation16_spill] sm:$0xff]  ;;  %2440 = vmatprep.subr.bf16.mxu1 %v2806_v1  ;;  %v3463_v36 = vsub.f32 %v3333_v20, %v4250_v62  ;;  %v3478_v1 = vld [vmem:[%s4063_s1 + $0x150] sm:$0xff]  ;;  %v4270_v40 = vand.u32 4294901760, %v3444_v22 }
  0x68   :  { %v3468_v4 = vsub.f32 %v3367_v6, %v4251_v45  ;;  %v3473_v54 = vsub.f32 %v3372_v14, %v4252_v2  ;;  %v3483_v62 = vld [vmem:[%s4063_s1 + $0x158] sm:$0xff]  ;;  %v4255_v45 = vand.u32 4294901760, %v3338_v16  ;;  %v3499_v14 = vsub.f32 %v3384_v53, %v4257_v38  ;;  %v3504_v6 = vld [vmem:[%s4063_s1 + $0x1e0] sm:$0xff]  ;;  %4267 = vst [vmem:[#allocation39_spill] sm:$0xff] %v3545_v8 }
  0x69   :  { %4248 = vst [vmem:[#allocation13_spill] sm:$0xff] %v3455_v25  ;;  %2406 = vmatpush3.bf16.msra.mxu0 %v4249_v28  ;;  %4254 = vst [vmem:[#allocation31_spill] sm:$0xff] %v3483_v62  ;;  %v4256_v28 = vand.u32 4294901760, %v3351_v35  ;;  %v4262_v38 = vand.u32 4294901760, %v3399_v3 }
  0x6a   :  { %4253 = vst [vmem:[#allocation16_spill] sm:$0xff] %v3473_v54  ;;  %2408 = vmatprep.subr.bf16.mxu0 %v3098_v31  ;;  %v3489_v34 = vsub.f32 %v3338_v16, %v4255_v45  ;;  %4258 = vst [vmem:[#allocation32_spill] sm:$0xff] %v3499_v14  ;;  %v3509_v31 = vld [vmem:[%s4063_s1 + $0x1e8] sm:$0xff]  ;;  %v3514_v45 = vld [vmem:[%s4063_s1 + $0x160] sm:$0xff]  ;;  %2442 = vmatpush3.bf16.msra.mxu1 %v2831_v19  ;;  %v3575_v19 = vsub.f32 %v3444_v22, %v4270_v40  ;;  %v4276_v40 = vand.u32 4294901760, %v3483_v62 }
  0x6b   :  { %v3494_v2 = vsub.f32 %v3351_v35, %v4256_v28  ;;  %4259 = vst [vmem:[#allocation33_spill] sm:$0xff] %v3504_v6  ;;  %4260 = vst [vmem:[#allocation34_spill] sm:$0xff] %v3509_v31  ;;  %v101_v28 = vcombine.high %v3455_v25, %v3455_v25  ;;  %v3521_v53 = vsub.f32 %v3399_v3, %v4262_v38  ;;  %v3534_v25 = vld [vmem:[%s4063_s1 + $0x1f0] sm:$0xff]  ;;  %v3539_v38 = vld [vmem:[%s4063_s1 + $0x1f8] sm:$0xff]  ;;  %2444 = vmatprep.subr.bf16.mxu1 %v2847_v52 }
  0x6c   :  { %4261 = vst [vmem:[#allocation35_spill] sm:$0xff] %v3514_v45  ;;  %4264 = vst [vmem:[#allocation37_spill] sm:$0xff] %v3534_v25  ;;  %v4269_v3 = vld [vmem:[#allocation17_spill] sm:$0xff]  ;;  %v3570_v52 = vld [vmem:[%s4063_s1 + $0x178] sm:$0xff]  ;;  %v3595_v55 = vsub.f32 %v3483_v62, %v4276_v40  ;;  %v4283_v40 = vand.u32 4294901760, %v3539_v38  ;;  %s2681_s1 = smov [#allocation2]  }
  0x6d   :  { %4263 = vst [vmem:[#allocation36_spill] sm:$0xff] %v3521_v53  ;;  %4265 = vst [vmem:[#allocation38_spill] sm:$0xff] %v3539_v38  ;;  %v3554_v61 = vand.u32 4294901760, %v101_v28  ;;  %2410 = vmatpush3.bf16.msra.mxu0 %v3104_v33  ;;  %v4275_v33 = vand.u32 4294901760, %v3478_v1  ;;  %v4279_v62 = vld [vmem:[#allocation18_spill] sm:$0xff]  ;;  %s1839_s24 = sshll.u32 %s2681_s1, 4  ;;  %s1840_s24 = int_to_ptr.vmem [resolvable:$true] %s1839_s24 }
  0x6e   :  { %2412 = vmatprep.subr.bf16.mxu0 %v4269_v3  ;;  %4271 = vst [vmem:[#allocation17_spill] sm:$0xff] %v3575_v19  ;;  %v4272_v3 = vand.u32 4294901760, %v3449_v48  ;;  %2446 = vmatpush3.bf16.msra.mxu1 %v2873_v10  ;;  %v4277_v10 = vand.u32 4294901760, %v3504_v6  ;;  %s2655_s25 = scalar_lea.vmem %s1840_s24, 32  ;;  %p2660_p1 = scmp.lt.s32.totalorder %s1840_s24, %s1840_s24 }
  0x6f   :  { %4268 = vst [vmem:[#allocation40_spill] sm:$0xff] %v3554_v61  ;;  %v3584_v12 = vsub.f32 %v101_v28, %v3554_v61  ;;  %v3590_v50 = vsub.f32 %v3478_v1, %v4275_v33  ;;  %2448 = vmatprep.subr.bf16.mxu1 %v2889_v63  ;;  %v4278_v33 = vand.u32 4294901760, %v3509_v31  ;;  %p2656_p0 = scmp.ne.s32.totalorder %s1840_s24, %s2655_s25  ;;  %p2661_p2 = scmp.lt.s32.totalorder %s2655_s25, %s2655_s25 }
  0x70   :  { %v3580_v8 = vsub.f32 %v3449_v48, %v4272_v3  ;;  %v3604_v28 = vsub.f32 %v3504_v6, %v4277_v10  ;;  %v4281_v48 = vand.u32 4294901760, %v3529_v7  ;;  %v4282_v6 = vand.u32 4294901760, %v3534_v25 }
  0x71   :  { %4274 = vst [vmem:[#allocation42_spill] sm:$0xff] %v3584_v12  ;;  %2414 = vmatpush3.bf16.msra.mxu0 %v3116_v56  ;;  %v3609_v30 = vsub.f32 %v3509_v31, %v4278_v33  ;;  %v4280_v56 = vand.u32 4294901760, %v3514_v45  ;;  %v3632_v3 = vsub.f32 %v3539_v38, %v4283_v40  ;;  %v4292_v38 = vand.u32 4294901760, %v3223_v24  ;;  %p2662_p3 = por %p2661_p2, %p2660_p1 }
  0x72   :  { %4273 = vst [vmem:[#allocation41_spill] sm:$0xff] %v3580_v8  ;;  %2416 = vmatprep.subr.bf16.mxu0 %v4279_v62  ;;  %v3622_v10 = vsub.f32 %v3529_v7, %v4281_v48  ;;  %v3627_v33 = vsub.f32 %v3534_v25, %v4282_v6  ;;  %v4152_v48 = vand.u32 4294901760, %v3584_v12  ;;  %2450 = vmatpush3.bf16.msra.mxu1 %v4209_v32  ;;  %v4288_v32 = vand.u32 4294901760, %v3200_v11 }
  0x73   :  { %v3617_v63 = vsub.f32 %v3514_v45, %v4280_v56  ;;  %v4284_v45 = vand.u32 4294901760, %v3552_v41  ;;  %2452 = vmatprep.subr.bf16.mxu1 %v4211_v9  ;;  %v4286_v56 = vand.u32 4294901760, %v3570_v52  ;;  %v4289_v6 = vand.u32 4294901760, %v3202_v13  ;;  %p2663_p4 = pnand %p2662_p3, %p2656_p0 }
  0x74   :  { %v4294_v9 = vand.u32 4294901760, %v3251_v39  ;;  %v4297_v62 = vand.u32 4294901760, %v3318_v17 }
  0x75   :  { %v3639_v31 = vsub.f32 %v3552_v41, %v4284_v45  ;;  %2418 = vmatpush3.bf16.msra.mxu0 %v3129_v15  ;;  %v3652_v45 = vsub.f32 %v3570_v52, %v4286_v56  ;;  %v1067_v56 = vsub.f32 %v3584_v12, %v4152_v48  ;;  %v3670_v25 = vpack.c.bf16 %v4289_v6, %v4288_v32 }
  0x76   :  { %2420 = vmatprep.subr.bf16.mxu0 %v3135_v27  ;;  %v4291_v27 = vand.u32 4294901760, %v3220_v37  ;;  %2454 = vmatpush3.bf16.msra.mxu1 %v4215_v47  ;;  %v4295_v48 = vand.u32 4294901760, %v3282_v58  ;;  %v4298_v12 = vand.u32 4294901760, %v3333_v20  ;;  %v4300_v32 = vand.u32 4294901760, %v3338_v16 }
  0x77   :  { %4285 = vst [vmem:[#allocation18_spill] sm:$0xff] %v3639_v31  ;;  %4287 = vst [vmem:[#allocation43_spill] sm:$0xff] %v3652_v45  ;;  %v4303_v47 = vand.u32 4294901760, %v3356_v51  ;;  %2456 = vmatprep.subr.bf16.mxu1 %v4216_v59  ;;  %v4315_v59 = vand.u32 4294901760, %v3499_v14 }
  0x78   :  { %4290 = vst [vmem:[#allocation44_spill] sm:$0xff] %v3670_v25  ;;  %v3676_v40 = vpack.c.bf16 %v4292_v38, %v4291_v27  ;;  %v3683_v15 = vpack.c.bf16 %v4295_v48, %v4294_v9  ;;  %v3689_v6 = vpack.c.bf16 %v4298_v12, %v4297_v62  ;;  %v4301_v25 = vand.u32 4294901760, %v3351_v35 }
  0x79   :  { %v4304_v27 = vand.u32 4294901760, %v3361_v5  ;;  %2422 = vmatpush3.bf16.msra.mxu0 %v3142_v29  ;;  %v4306_v12 = vand.u32 4294901760, %v3392_v23  ;;  %v4307_v62 = vand.u32 4294901760, %v3415_v18  ;;  %v4313_v29 = vand.u32 4294901760, %v3473_v54 }
  0x7a   :  { %4293 = vst [vmem:[#allocation45_spill] sm:$0xff] %v3676_v40  ;;  %4296 = vst [vmem:[#allocation46_spill] sm:$0xff] %v3683_v15  ;;  %v3695_v38 = vpack.c.bf16 %v4301_v25, %v4300_v32  ;;  %v4309_v25 = vand.u32 4294901760, %v3426_v43  ;;  %v4310_v32 = vand.u32 4294901760, %v3433_v42  ;;  %2424 = vmatprep.subr.bf16.mxu0 %v3144_v57  ;;  %v4316_v48 = vand.u32 4294901760, %v3521_v53  ;;  %2458 = vmatpush3.bf16.msra.mxu1 %v4223_v60  ;;  %v4354_v15 = vld [vmem:[#allocation22_spill] sm:$0xff] }
  0x7b   :  { %4299 = vst [vmem:[#allocation47_spill] sm:$0xff] %v3689_v6  ;;  %v3701_v40 = vpack.c.bf16 %v4304_v27, %v4303_v47  ;;  %v3710_v9 = vpack.c.bf16 %v4307_v62, %v4306_v12  ;;  %v4312_v47 = vand.u32 4294901760, %v3468_v4  ;;  %v4318_v62 = vand.u32 4294901760, %v3575_v19  ;;  %2492 = vmatprep.subr.bf16.mxu1 %v3387_v46  ;;  %v4353_v6 = vld [vmem:[#allocation28_spill] sm:$0xff] }
  0x7c   :  { %4302 = vst [vmem:[#allocation48_spill] sm:$0xff] %v3695_v38  ;;  %v3716_v38 = vpack.c.bf16 %v4310_v32, %v4309_v25  ;;  %v3729_v12 = vpack.c.bf16 %v4316_v48, %v4315_v59  ;;  %v4321_v32 = vand.u32 4294901760, %v3590_v50  ;;  %v4324_v57 = vand.u32 4294901760, %v3604_v28 }
  0x7d   :  { %4305 = vst [vmem:[#allocation49_spill] sm:$0xff] %v3701_v40  ;;  %4308 = vst [vmem:[#allocation50_spill] sm:$0xff] %v3710_v9  ;;  %v3722_v27 = vpack.c.bf16 %v4313_v29, %v4312_v47  ;;  %v4319_v9 = vand.u32 4294901760, %v3580_v8  ;;  %v4325_v29 = vand.u32 4294901760, %v3609_v30  ;;  %v4327_v48 = vand.u32 4294901760, %v3361_v5  ;;  %2426 = vmatpush3.bf16.msra.mxu0 %v3146_v44  ;;  %v4343_v44 = vld [vmem:[#allocation6_spill] sm:$0xff] }
  0x7e   :  { %4311 = vst [vmem:[#allocation51_spill] sm:$0xff] %v3716_v38  ;;  %4317 = vst [vmem:[#allocation53_spill] sm:$0xff] %v3729_v12  ;;  %v4322_v38 = vand.u32 4294901760, %v3595_v55  ;;  %v4328_v12 = vand.u32 4294901760, %v3617_v63  ;;  %2460 = vmatprep.subr.bf16.mxu0 %v3299_v21 }
  0x7f   :  { %4314 = vst [vmem:[#allocation52_spill] sm:$0xff] %v3722_v27  ;;  %v3735_v25 = vpack.c.bf16 %v4319_v9, %v4318_v62  ;;  %v3747_v27 = vpack.c.bf16 %v4325_v29, %v4324_v57  ;;  %v1119_v59 = vsub.f32 %v3361_v5, %v4327_v48  ;;  %v4329_v9 = vand.u32 4294901760, %v3622_v10 }
  0x80   :  { %v3741_v47 = vpack.c.bf16 %v4322_v38, %v4321_v32  ;;  %v4332_v38 = vand.u32 4294901760, %v3632_v3  ;;  %v4335_v57 = vand.u32 4294901760, %v3652_v45  ;;  %v1099_v48 = vand.u32 4294901760, %v3438_v0 }
  0x81   :  { %4320 = vst [vmem:[#allocation54_spill] sm:$0xff] %v3735_v25  ;;  %4326 = vst [vmem:[#allocation56_spill] sm:$0xff] %v3747_v27  ;;  %v3756_v62 = vpack.c.bf16 %v4329_v9, %v4328_v12  ;;  %v4331_v25 = vand.u32 4294901760, %v3627_v33  ;;  %v1106_v27 = vand.u32 4294901760, %v3463_v36  ;;  %v1225_v12 = vand.u32 4294901760, %v3489_v34  ;;  %v4341_v34 = vld [vmem:[#allocation5_spill] sm:$0xff] }
  0x82   :  { %4323 = vst [vmem:[#allocation55_spill] sm:$0xff] %v3741_v47  ;;  %v4334_v47 = vand.u32 4294901760, %v3639_v31  ;;  %v1232_v9 = vand.u32 4294901760, %v3494_v2  ;;  %v4340_v0 = vand.u32 4294901760, %v3415_v18  ;;  %v4342_v2 = vand.u32 4294901760, %v4341_v34  ;;  %v4349_v34 = vld [vmem:[#allocation9_spill] sm:$0xff] }
  0x83   :  { %4330 = vst [vmem:[#allocation57_spill] sm:$0xff] %v3756_v62  ;;  %v3762_v32 = vpack.c.bf16 %v4332_v38, %v4331_v25  ;;  %v4337_v25 = vand.u32 4294901760, %v3378_v26  ;;  %v4338_v38 = vand.u32 4294901760, %v3406_v49  ;;  %v1068_v26 = vand.u32 4294901760, %v1067_v56  ;;  %v4346_v49 = vld [vmem:[#allocation39_spill] sm:$0xff] }
  0x84   :  { %v3768_v29 = vpack.c.bf16 %v4335_v57, %v4334_v47  ;;  %v4339_v57 = vand.u32 4294901760, %v3392_v23  ;;  %v1245_v36 = vsub.f32 %v3415_v18, %v4340_v0  ;;  %v4348_v0 = vand.u32 4294901760, %v3433_v42 }
  0x85   :  { %4333 = vst [vmem:[#allocation58_spill] sm:$0xff] %v3762_v32  ;;  %v2495_v47 = vpack.c.bf16 %v4338_v38, %v4337_v25  ;;  %v4345_v32 = vld [vmem:[#allocation14_spill] sm:$0xff]  ;;  %v1113_v25 = vand.u32 4294901760, %v4346_v49  ;;  %v1120_v38 = vand.u32 4294901760, %v1119_v59  ;;  %v2497_v49 = vpack.c.bf16 %v1106_v27, %v1099_v48 }
  0x86   :  { %4336 = vst [vmem:[#allocation59_spill] sm:$0xff] %v3768_v29  ;;  %v1238_v60 = vsub.f32 %v3392_v23, %v4339_v57  ;;  %v4344_v29 = vand.u32 4294901760, %v4343_v44  ;;  %963 = vmatmul.mubr.f32.vlgmr.msra.gmra.mrb[4].mxu1 %v4345_v32  ;;  %v4347_v57 = vand.u32 4294901760, %v3426_v43  ;;  %v1133_v40 = vsub.f32 %v3433_v42, %v4348_v0  ;;  %859 = vmatmul.mubr.f32.vlgmr.msra.gmra.mrb[4].mxu0 %v4345_v32 }
  0x87   :  { %v4350_v44 = vand.u32 4294901760, %v4349_v34  ;;  %2494 = vmatpush3.bf16.msra.mxu1 %v4353_v6  ;;  %v2499_v59 = vpack.c.bf16 %v1232_v9, %v1225_v12  ;;  %2462 = vmatpush3.bf16.msra.mxu0 %v4354_v15  ;;  %v4355_v18 = vand.u32 4294901760, %v3468_v4  ;;  %v4356_v32 = vand.u32 4294901760, %v3473_v54  ;;  %v4359_v6 = vld [vmem:[#allocation8_spill] sm:$0xff] }
  0x88   :  { %v3792_v46 = vpack.c.bf16 %v4344_v29, %v4342_v2  ;;  %v1126_v62 = vsub.f32 %v3426_v43, %v4347_v57  ;;  %v4351_v29 = vld [vmem:[#allocation10_spill] sm:$0xff]  ;;  %2496 = vmatprep.subr.bf16.mxu1 %v2495_v47  ;;  %v1239_v57 = vand.u32 4294901760, %v1238_v60  ;;  %v1246_v43 = vand.u32 4294901760, %v1245_v36  ;;  %1069 = vmatprep.mubr.f32.mxu0 %v1068_v26 }
  0x89   :  { %v4352_v2 = vand.u32 4294901760, %v4351_v29  ;;  %v1252_v0 = vsub.f32 %v3468_v4, %v4355_v18  ;;  %v1259_v34 = vsub.f32 %v3473_v54, %v4356_v32  ;;  %v4360_v27 = vand.u32 4294901760, %v4359_v6  ;;  %1305 = vmatprep.mubr.f32.mxu1 %v3554_v61  ;;  %v4371_v61 = vld [vmem:[#allocation12_spill] sm:$0xff] }
  0x8a   :  { %2464 = vmatprep.subr.bf16.mxu0 %v3792_v46  ;;  %v2501_v12 = vpack.c.bf16 %v1120_v38, %v1113_v25  ;;  %v1127_v9 = vand.u32 4294901760, %v1126_v62  ;;  %v1134_v47 = vand.u32 4294901760, %v1133_v40  ;;  %v4361_v18 = vand.u32 4294901760, %v3499_v14  ;;  %v4365_v40 = vld [vmem:[#allocation19_spill] sm:$0xff]  ;;  %v4367_v38 = vld [vmem:[#allocation20_spill] sm:$0xff] }
  0x8b   :  { %v3807_v56 = vpack.c.bf16 %v4352_v2, %v4350_v44  ;;  %v4357_v44 = vld [vmem:[#allocation7_spill] sm:$0xff]  ;;  %2498 = vmatpush3.bf16.msra.mxu1 %v2497_v49  ;;  %v4362_v36 = vand.u32 4294901760, %v3521_v53  ;;  %v4363_v32 = vand.u32 4294901760, %v3575_v19  ;;  %v4364_v26 = vand.u32 4294901760, %v3580_v8 }
  0x8c   :  { %v4358_v29 = vand.u32 4294901760, %v4357_v44  ;;  %v1140_v60 = vsub.f32 %v3499_v14, %v4361_v18  ;;  %v4366_v25 = vand.u32 4294901760, %v4365_v40  ;;  %v4368_v49 = vand.u32 4294901760, %v4367_v38  ;;  %2500 = vmatprep.subr.bf16.mxu1 %v2499_v59  ;;  %v4375_v14 = vld [vmem:[#allocation23_spill] sm:$0xff] }
  0x8d   :  { %v1147_v2 = vsub.f32 %v3521_v53, %v4362_v36  ;;  %v1266_v44 = vsub.f32 %v3575_v19, %v4363_v32  ;;  %v1273_v62 = vsub.f32 %v3580_v8, %v4364_v26  ;;  %2466 = vmatpush3.bf16.msra.mxu0 %v3807_v56  ;;  %v2503_v6 = vpack.c.bf16 %v1246_v43, %v1239_v57  ;;  %v4369_v36 = vld [vmem:[#allocation11_spill] sm:$0xff]  ;;  %v4373_v26 = vld [vmem:[#allocation21_spill] sm:$0xff] }
  0x8e   :  { %v3822_v48 = vpack.c.bf16 %v4360_v27, %v4358_v29  ;;  %v3842_v29 = vpack.c.bf16 %v4368_v49, %v4366_v25  ;;  %v1253_v27 = vand.u32 4294901760, %v1252_v0  ;;  %v1260_v18 = vand.u32 4294901760, %v1259_v34 }
  0x8f   :  { %v4370_v32 = vand.u32 4294901760, %v4369_v36  ;;  %v4372_v19 = vand.u32 4294901760, %v4371_v61  ;;  %v4374_v8 = vand.u32 4294901760, %v4373_v26  ;;  %v4376_v40 = vand.u32 4294901760, %v4375_v14  ;;  %2502 = vmatpush3.bf16.msra.mxu1 %v2501_v12  ;;  %v4381_v36 = vld [vmem:[#allocation15_spill] sm:$0xff] }
  0x90   :  { %2468 = vmatprep.subr.bf16.mxu0 %v3822_v48  ;;  %v2505_v25 = vpack.c.bf16 %v1134_v47, %v1127_v9  ;;  %v4377_v59 = vand.u32 4294901760, %v3590_v50  ;;  %v4378_v57 = vand.u32 4294901760, %v3595_v55  ;;  %v1141_v34 = vand.u32 4294901760, %v1140_v60  ;;  %2504 = vmatprep.subr.bf16.mxu1 %v2503_v6  ;;  %v4383_v60 = vld [vmem:[#allocation24_spill] sm:$0xff]  ;;  %v4387_v6 = vld [vmem:[#allocation26_spill] sm:$0xff] }
  0x91   :  { %v3849_v53 = vpack.c.bf16 %v4372_v19, %v4370_v32  ;;  %v3855_v54 = vpack.c.bf16 %v4376_v40, %v4374_v8  ;;  %v1148_v61 = vand.u32 4294901760, %v1147_v2  ;;  %v1267_v19 = vand.u32 4294901760, %v1266_v44  ;;  %2470 = vmatpush3.bf16.msra.mxu0 %v3842_v29 }
  0x92   :  { %v1154_v43 = vsub.f32 %v3590_v50, %v4377_v59  ;;  %v1161_v0 = vsub.f32 %v3595_v55, %v4378_v57  ;;  %v1274_v38 = vand.u32 4294901760, %v1273_v62  ;;  %v2507_v14 = vpack.c.bf16 %v1260_v18, %v1253_v27  ;;  %v4385_v62 = vld [vmem:[#allocation25_spill] sm:$0xff] }
  0x93   :  { %v4379_v8 = vand.u32 4294901760, %v3604_v28  ;;  %v4380_v47 = vand.u32 4294901760, %v3609_v30  ;;  %2472 = vmatprep.subr.bf16.mxu0 %v3849_v53  ;;  %v4382_v12 = vand.u32 4294901760, %v4381_v36  ;;  %v4384_v2 = vand.u32 4294901760, %v4383_v60  ;;  %v4389_v59 = vld [vmem:[#allocation13_spill] sm:$0xff]  ;;  %2506 = vmatpush3.bf16.msra.mxu1 %v2505_v25 }
  0x94   :  { %v4386_v32 = vand.u32 4294901760, %v4385_v62  ;;  %v4388_v27 = vand.u32 4294901760, %v4387_v6  ;;  %v1155_v26 = vand.u32 4294901760, %v1154_v43  ;;  %v1162_v40 = vand.u32 4294901760, %v1161_v0  ;;  %2508 = vmatprep.subr.bf16.mxu1 %v2507_v14 }
  0x95   :  { %v1280_v9 = vsub.f32 %v3604_v28, %v4379_v8  ;;  %v1287_v49 = vsub.f32 %v3609_v30, %v4380_v47  ;;  %v3875_v44 = vpack.c.bf16 %v4384_v2, %v4382_v12  ;;  %v3884_v57 = vand.u32 4294901760, %v4389_v59  ;;  %2474 = vmatpush3.bf16.msra.mxu0 %v3855_v54 }
  0x96   :  { %v3881_v18 = vpack.c.bf16 %v4388_v27, %v4386_v32  ;;  %v2509_v8 = vpack.c.bf16 %v1148_v61, %v1141_v34  ;;  %v2511_v47 = vpack.c.bf16 %v1274_v38, %v1267_v19  ;;  %v4390_v36 = vand.u32 4294901760, %v3617_v63  ;;  %v4395_v19 = vld [vmem:[#allocation30_spill] sm:$0xff] }
  0x97   :  { %v4391_v12 = vand.u32 4294901760, %v3622_v10  ;;  %v1281_v62 = vand.u32 4294901760, %v1280_v9  ;;  %v1288_v43 = vand.u32 4294901760, %v1287_v49  ;;  %v4392_v0 = vand.u32 4294901760, %v3627_v33  ;;  %2476 = vmatprep.subr.bf16.mxu0 %v3875_v44 }
  0x98   :  { %v1168_v60 = vsub.f32 %v3617_v63, %v4390_v36  ;;  %v4393_v25 = vand.u32 4294901760, %v3632_v3  ;;  %v4394_v61 = vand.u32 4294901760, %v3444_v22  ;;  %v4396_v38 = vand.u32 4294901760, %v4395_v19  ;;  %2510 = vmatpush3.bf16.msra.mxu1 %v2509_v8 }
  0x99   :  { %v1175_v2 = vsub.f32 %v3622_v10, %v4391_v12  ;;  %v1294_v32 = vsub.f32 %v3627_v33, %v4392_v0  ;;  %v2513_v27 = vpack.c.bf16 %v1162_v40, %v1155_v26  ;;  %v3908_v14 = vsub.f32 %v4389_v59, %v3884_v57  ;;  %2478 = vmatpush3.bf16.msra.mxu0 %v3881_v18  ;;  %v4400_v26 = vld [vmem:[#allocation31_spill] sm:$0xff] }
  0x9a   :  { %v1301_v34 = vsub.f32 %v3632_v3, %v4393_v25  ;;  %v3904_v6 = vpack.c.bf16 %v4396_v38, %v4394_v61  ;;  %v1169_v9 = vand.u32 4294901760, %v1168_v60  ;;  %v4397_v36 = vand.u32 4294901760, %v3639_v31  ;;  %2512 = vmatprep.subr.bf16.mxu1 %v2511_v47  ;;  %v4404_v38 = vld [vmem:[#allocation34_spill] sm:$0xff]  ;;  %v4406_v47 = vld [vmem:[#allocation35_spill] sm:$0xff] }
  0x9b   :  { %v1176_v49 = vand.u32 4294901760, %v1175_v2  ;;  %v4398_v0 = vand.u32 4294901760, %v3652_v45  ;;  %v4399_v25 = vand.u32 4294901760, %v3478_v1  ;;  %v4401_v40 = vand.u32 4294901760, %v4400_v26  ;;  %v4402_v2 = vld [vmem:[#allocation33_spill] sm:$0xff] }
  0x9c   :  { %v1182_v12 = vsub.f32 %v3639_v31, %v4397_v36  ;;  %v2515_v59 = vpack.c.bf16 %v1288_v43, %v1281_v62  ;;  %v1295_v8 = vand.u32 4294901760, %v1294_v32  ;;  %v1302_v60 = vand.u32 4294901760, %v1301_v34  ;;  %2480 = vmatprep.subr.bf16.mxu0 %v3904_v6  ;;  %2514 = vmatpush3.bf16.msra.mxu1 %v2513_v27  ;;  %v4411_v27 = vld [vmem:[#allocation38_spill] sm:$0xff] }
  0x9d   :  { %v1189_v22 = vsub.f32 %v3652_v45, %v4398_v0  ;;  %v3921_v61 = vpack.c.bf16 %v4401_v40, %v4399_v25  ;;  %v4403_v19 = vand.u32 4294901760, %v4402_v2  ;;  %v4405_v36 = vand.u32 4294901760, %v4404_v38  ;;  %v4409_v25 = vld [vmem:[#allocation37_spill] sm:$0xff] }
  0x9e   :  { %v1072_v0 = vand.u32 4294901760, %v3908_v14  ;;  %v2517_v1 = vpack.c.bf16 %v1176_v49, %v1169_v9  ;;  %v1183_v45 = vand.u32 4294901760, %v1182_v12  ;;  %v4407_v62 = vand.u32 4294901760, %v4406_v47  ;;  %2516 = vmatprep.subr.bf16.mxu1 %v2515_v59  ;;  %v4423_v38 = vld [vmem:[#allocation41_spill] sm:$0xff] }
  0x9f   :  { %v3928_v31 = vpack.c.bf16 %v4405_v36, %v4403_v19  ;;  %v1190_v26 = vand.u32 4294901760, %v1189_v22  ;;  %2482 = vmatpush3.bf16.msra.mxu0 %v3921_v61  ;;  %v4408_v43 = vand.u32 4294901760, %v3529_v7  ;;  %v2519_v34 = vpack.c.bf16 %v1302_v60, %v1295_v8 }
  0xa0   :  { %v4410_v40 = vand.u32 4294901760, %v4409_v25  ;;  %v4412_v2 = vand.u32 4294901760, %v4411_v27  ;;  %v1073_v9 = vsub.f32 %v3908_v14, %v1072_v0  ;;  %2518 = vmatpush3.bf16.msra.mxu1 %v2517_v1  ;;  %v4413_v7 = vand.u32 4294901760, %v3552_v41 }
  0xa1   :  { %v3936_v32 = vpack.c.bf16 %v4408_v43, %v4407_v62  ;;  %2484 = vmatprep.subr.bf16.mxu0 %v3928_v31  ;;  %v2521_v49 = vpack.c.bf16 %v1190_v26, %v1183_v45  ;;  %v4414_v12 = vand.u32 4294901760, %v3570_v52  ;;  %2520 = vmatprep.subr.bf16.mxu1 %v2519_v34  ;;  %v2523_v59 = vpack.c.bf16 %v3202_v13, %v3200_v11 }
  0xa2   :  { %v3943_v19 = vpack.c.bf16 %v4412_v2, %v4410_v40  ;;  %v1074_v8 = vand.u32 4294901760, %v1073_v9  ;;  %v2525_v45 = vpack.c.bf16 %v3223_v24, %v3220_v37  ;;  %v2527_v41 = vpack.c.bf16 %v3282_v58, %v3251_v39  ;;  %v4415_v37 = vld [vmem:[#allocation42_spill] sm:$0xff]  ;;  %v4417_v58 = vld [vmem:[#allocation27_spill] sm:$0xff] }
  0xa3   :  { %2486 = vmatpush3.bf16.msra.mxu0 %v3936_v32  ;;  %v3953_v22 = vpack.c.bf16 %v4414_v12, %v4413_v7  ;;  %v2529_v11 = vpack.c.bf16 %v3333_v20, %v3318_v17  ;;  %v2531_v13 = vpack.c.bf16 %v3351_v35, %v3338_v16  ;;  %v4416_v24 = vand.u32 4294901760, %v4415_v37  ;;  %v4418_v20 = vld [vmem:[#allocation29_spill] sm:$0xff]  ;;  %v4419_v35 = vld [vmem:[#allocation16_spill] sm:$0xff] }
  0xa4   :  { %2488 = vmatprep.subr.bf16.mxu0 %v3943_v19  ;;  %2522 = vmatpush3.bf16.msra.mxu1 %v2521_v49  ;;  %v2533_v39 = vpack.c.bf16 %v3361_v5, %v3356_v51  ;;  %v2535_v17 = vpack.c.bf16 %v4417_v58, %v3392_v23  ;;  %v2537_v16 = vpack.c.bf16 %v3433_v42, %v4418_v20  ;;  %v4420_v5 = vld [vmem:[#allocation32_spill] sm:$0xff]  ;;  %v4422_v23 = vld [vmem:[#allocation17_spill] sm:$0xff]  ;;  %v2680_v49 = vmov 0.0  }
  0xa5   :  { %2556 = vmatprep.subr.bf16.mxu1 %v3299_v21  ;;  %v2539_v52 = vpack.c.bf16 %v4419_v35, %v3468_v4  ;;  %v4421_v51 = vld [vmem:[#allocation36_spill] sm:$0xff]  ;;  %v2543_v36 = vpack.c.bf16 %v4423_v38, %v4422_v23  ;;  %v2545_v42 = vpack.c.bf16 %v3595_v55, %v3590_v50  ;;  %v2547_v4 = vpack.c.bf16 %v3609_v30, %v3604_v28  ;;  %v4424_v55 = vld [vmem:[#allocation18_spill] sm:$0xff]  ;;  %v4425_v50 = vld [vmem:[#allocation43_spill] sm:$0xff] }
  0xa6   :  { %v2541_v60 = vpack.c.bf16 %v4421_v51, %v4420_v5  ;;  %v2549_v1 = vpack.c.bf16 %v3622_v10, %v3617_v63  ;;  %v2551_v26 = vpack.c.bf16 %v3632_v3, %v3627_v33  ;;  %v2553_v47 = vpack.c.bf16 %v4425_v50, %v4424_v55  ;;  %v4426_v30 = vld [vmem:[#allocation44_spill] sm:$0xff]  ;;  %v4427_v3 = vld [vmem:[#allocation45_spill] sm:$0xff]  ;;  %v4428_v28 = vld [vmem:[#allocation46_spill] sm:$0xff]  ;;  %17 = vst.msk [vmem:[#allocation2] sm:$0x3] %vm16_vm0, %v2680_v49 }
  0xa7   :  { %2490 = vmatpush3.bf16.msra.mxu0 %v3953_v22  ;;  %1307 = vmatmul.mubr.f32.vlgmr.msra.gmra.mrb[6].mxu1 %v3884_v57  ;;  %v4429_v63 = vld [vmem:[#allocation40_spill] sm:$0xff]  ;;  %v4432_v33 = vld [vmem:[#allocation49_spill] sm:$0xff] }
  0xa8   :  { %2524 = vmatprep.subr.bf16.mxu0 %v2523_v59  ;;  %2558 = vmatpush3.bf16.msra.mxu1 %v4354_v15  ;;  %v4431_v10 = vld [vmem:[#allocation48_spill] sm:$0xff] }
  0xa9   :  { %2560 = vmatprep.subr.bf16.mxu1 %v3792_v46  ;;  %1549 = vmatprep.mubr.f32.mxu1 %v4416_v24 }
  0xaa   :  { %1075 = vmatmul.mubr.f32.vlgmr.msra.gmra.mrb[6].mxu0 %v1074_v8 }
  0xab   :  { %2526 = vmatpush3.bf16.msra.mxu0 %v2525_v45  ;;  %1442 = vmatprep.mubr.f32.mxu0 %v4415_v37 }
  0xac   :  { %2528 = vmatprep.subr.bf16.mxu0 %v2527_v41  ;;  %2562 = vmatpush3.bf16.msra.mxu1 %v3807_v56 }
  0xad   :  { %2564 = vmatprep.subr.bf16.mxu1 %v3822_v48 }
  0xaf   :  { %2530 = vmatpush3.bf16.msra.mxu0 %v2529_v11 }
  0xb0   :  { %2532 = vmatprep.subr.bf16.mxu0 %v2531_v13  ;;  %2566 = vmatpush3.bf16.msra.mxu1 %v3842_v29 }
  0xb1   :  { %2568 = vmatprep.subr.bf16.mxu1 %v3849_v53 }
  0xb3   :  { %2534 = vmatpush3.bf16.msra.mxu0 %v2533_v39 }
  0xb4   :  { %2536 = vmatprep.subr.bf16.mxu0 %v2535_v17  ;;  %2570 = vmatpush3.bf16.msra.mxu1 %v3855_v54 }
  0xb5   :  { %2572 = vmatprep.subr.bf16.mxu1 %v3875_v44 }
  0xb7   :  { %2538 = vmatpush3.bf16.msra.mxu0 %v2537_v16 }
  0xb8   :  { %2540 = vmatprep.subr.bf16.mxu0 %v2539_v52  ;;  %2574 = vmatpush3.bf16.msra.mxu1 %v3881_v18 }
  0xb9   :  { %2576 = vmatprep.subr.bf16.mxu1 %v3904_v6 }
  0xbb   :  { %2542 = vmatpush3.bf16.msra.mxu0 %v2541_v60 }
  0xbc   :  { %2544 = vmatprep.subr.bf16.mxu0 %v2543_v36  ;;  %2578 = vmatpush3.bf16.msra.mxu1 %v3921_v61 }
  0xbd   :  { %2580 = vmatprep.subr.bf16.mxu1 %v3928_v31 }
  0xbf   :  { %2546 = vmatpush3.bf16.msra.mxu0 %v2545_v42 }
  0xc0   :  { %2548 = vmatprep.subr.bf16.mxu0 %v2547_v4  ;;  %2582 = vmatpush3.bf16.msra.mxu1 %v3936_v32 }
  0xc1   :  { %2584 = vmatprep.subr.bf16.mxu1 %v3943_v19 }
  0xc3   :  { %2550 = vmatpush3.bf16.msra.mxu0 %v2549_v1 }
  0xc4   :  { %2552 = vmatprep.subr.bf16.mxu0 %v2551_v26  ;;  %2586 = vmatpush3.bf16.msra.mxu1 %v3953_v22 }
  0xc5   :  { %2620 = vmatprep.subr.bf16.mxu1 %v3299_v21  ;;  %v4430_v21 = vld [vmem:[#allocation47_spill] sm:$0xff] }
  0xc7   :  { %2554 = vmatpush3.bf16.msra.mxu0 %v2553_v47  ;;  %1553 = vmatmul.mubr.f32.vlgmr.msra.gmra.mrb[8].mxu1 %v1072_v0 }
  0xc8   :  { %2588 = vmatprep.subr.bf16.mxu0 %v4426_v30  ;;  %2622 = vmatpush3.bf16.msra.mxu1 %v4354_v15  ;;  %v4433_v15 = vld [vmem:[#allocation50_spill] sm:$0xff]  ;;  %v18_v30 = vld [vmem:[#allocation2] sm:$0x3] }
  0xc9   :  { %2624 = vmatprep.subr.bf16.mxu1 %v3792_v46  ;;  %1823 = vmatprep.mubr.f32.mxu1 %v4429_v63  ;;  %v4434_v46 = vld [vmem:[#allocation51_spill] sm:$0xff] }
  0xca   :  { %1445 = vmatmul.mubr.f32.vlgmr.msra.gmra.mrb[8].mxu0 %v3908_v14 }
  0xcb   :  { %2590 = vmatpush3.bf16.msra.mxu0 %v4427_v3  ;;  %1719 = vmatprep.mubr.f32.mxu0 %v4429_v63 }
  0xcc   :  { %2592 = vmatprep.subr.bf16.mxu0 %v4428_v28  ;;  %2626 = vmatpush3.bf16.msra.mxu1 %v3807_v56  ;;  %v4435_v56 = vld [vmem:[#allocation52_spill] sm:$0xff] }
  0xcd   :  { %2628 = vmatprep.subr.bf16.mxu1 %v3822_v48  ;;  %v4436_v48 = vld [vmem:[#allocation53_spill] sm:$0xff] }
  0xcf   :  { %2594 = vmatpush3.bf16.msra.mxu0 %v4430_v21 }
  0xd0   :  { %2596 = vmatprep.subr.bf16.mxu0 %v4431_v10  ;;  %2630 = vmatpush3.bf16.msra.mxu1 %v3842_v29  ;;  %v4437_v29 = vld [vmem:[#allocation54_spill] sm:$0xff] }
  0xd1   :  { %2632 = vmatprep.subr.bf16.mxu1 %v3849_v53  ;;  %v4438_v53 = vld [vmem:[#allocation55_spill] sm:$0xff] }
  0xd3   :  { %2598 = vmatpush3.bf16.msra.mxu0 %v4432_v33 }
  0xd4   :  { %2600 = vmatprep.subr.bf16.mxu0 %v4433_v15  ;;  %2634 = vmatpush3.bf16.msra.mxu1 %v3855_v54  ;;  %v4439_v54 = vld [vmem:[#allocation56_spill] sm:$0xff] }
  0xd5   :  { %2636 = vmatprep.subr.bf16.mxu1 %v3875_v44  ;;  %v4440_v44 = vld [vmem:[#allocation57_spill] sm:$0xff] }
  0xd7   :  { %2602 = vmatpush3.bf16.msra.mxu0 %v4434_v46 }
  0xd8   :  { %2604 = vmatprep.subr.bf16.mxu0 %v4435_v56  ;;  %2638 = vmatpush3.bf16.msra.mxu1 %v3881_v18  ;;  %v4441_v18 = vld [vmem:[#allocation58_spill] sm:$0xff] }
  0xd9   :  { %2640 = vmatprep.subr.bf16.mxu1 %v3904_v6  ;;  %v4442_v6 = vld [vmem:[#allocation59_spill] sm:$0xff] }
  0xdb   :  { %2606 = vmatpush3.bf16.msra.mxu0 %v4436_v48 }
  0xdc   :  { %2608 = vmatprep.subr.bf16.mxu0 %v4437_v29  ;;  %2642 = vmatpush3.bf16.msra.mxu1 %v3921_v61 }
  0xdd   :  { %2644 = vmatprep.subr.bf16.mxu1 %v3928_v31 }
  0xdf   :  { %2610 = vmatpush3.bf16.msra.mxu0 %v4438_v53 }
  0xe0   :  { %2612 = vmatprep.subr.bf16.mxu0 %v4439_v54  ;;  %2646 = vmatpush3.bf16.msra.mxu1 %v3936_v32 }
  0xe1   :  { %2648 = vmatprep.subr.bf16.mxu1 %v3943_v19 }
  0xe3   :  { %2614 = vmatpush3.bf16.msra.mxu0 %v4440_v44 }
  0xe4   :  { %2616 = vmatprep.subr.bf16.mxu0 %v4441_v18  ;;  %2650 = vmatpush3.bf16.msra.mxu1 %v3953_v22 }
  0xe7   :  { %2618 = vmatpush3.bf16.msra.mxu0 %v4442_v6  ;;  %1825 = vmatmul.mubr.f32.vlgmr.msra.gmra.mrb[10].mxu1 %v3884_v57 }
  0xea   :  { %1721 = vmatmul.mubr.f32.vlgmr.msra.gmra.mrb[10].mxu0 %v3884_v57 }
 0x110   :  { %v1914_v14 = vpop.f32.mrb[0].mxu1 }
 0x111   :  { %v1915_v61 = vpop.f32.mrb[1].mxu1 }
 0x112   :  { %v1916_v62 = vadd.f32 %v1915_v61, %v1914_v14 }
 0x113   :  { %v1879_v31 = vpop.f32.mrb[0].mxu0 }
 0x114   :  { %v1880_v0 = vpop.f32.mrb[1].mxu0 }
 0x115   :  { %v1881_v43 = vadd.f32 %v1880_v0, %v1879_v31 }
 0x117   :  { %v447_v32 = vadd.f32 %v1916_v62, %v1881_v43 }
 0x130   :  { %v1984_v34 = vpop.f32.mrb[2].mxu1 }
 0x131   :  { %v1985_v40 = vpop.f32.mrb[3].mxu1 }
 0x132   :  { %v1986_v2 = vadd.f32 %v1985_v40, %v1984_v34 }
 0x133   :  { %v1949_v25 = vpop.f32.mrb[2].mxu0 }
 0x134   :  { %v1950_v27 = vpop.f32.mrb[3].mxu0 }
 0x135   :  { %v1951_v19 = vadd.f32 %v1950_v27, %v1949_v25 }
 0x137   :  { %v585_v9 = vadd.f32 %v1951_v19, %v447_v32 }
 0x139   :  { %v693_v7 = vadd.f32 %v1986_v2, %v585_v9 }
 0x159   :  { %v2054_v57 = vpop.f32.mrb[4].mxu1  ;;  %v2019_v12 = vpop.f32.mrb[4].mxu0 }
 0x15a   :  { %v2055_v22 = vpop.f32.mrb[5].mxu1  ;;  %v2020_v59 = vpop.f32.mrb[5].mxu0 }
 0x15b   :  { %v2056_v8 = vadd.f32 %v2055_v22, %v2054_v57  ;;  %v2021_v45 = vadd.f32 %v2020_v59, %v2019_v12 }
 0x15d   :  { %v861_v41 = vadd.f32 %v2021_v45, %v693_v7 }
 0x15f   :  { %v965_v11 = vadd.f32 %v2056_v8, %v861_v41 }
 0x17a   :  { %v2124_v13 = vpop.f32.mrb[6].mxu1 }
 0x17b   :  { %v2125_v24 = vpop.f32.mrb[7].mxu1 }
 0x17c   :  { %v2126_v58 = vadd.f32 %v2125_v24, %v2124_v13 }
 0x17d   :  { %v2089_v37 = vpop.f32.mrb[6].mxu0 }
 0x17e   :  { %v2090_v39 = vpop.f32.mrb[7].mxu0 }
 0x17f   :  { %v2091_v17 = vadd.f32 %v2090_v39, %v2089_v37 }
 0x181   :  { %v1077_v20 = vadd.f32 %v2091_v17, %v965_v11 }
 0x183   :  { %v1309_v16 = vadd.f32 %v2126_v58, %v1077_v20 }
 0x19a   :  { %v2194_v35 = vpop.f32.mrb[8].mxu1 }
 0x19b   :  { %v2195_v5 = vpop.f32.mrb[9].mxu1 }
 0x19c   :  { %v2196_v60 = vadd.f32 %v2195_v5, %v2194_v35 }
 0x19d   :  { %v2159_v52 = vpop.f32.mrb[8].mxu0 }
 0x19e   :  { %v2160_v51 = vpop.f32.mrb[9].mxu0 }
 0x19f   :  { %v2161_v23 = vadd.f32 %v2160_v51, %v2159_v52 }
 0x1a1   :  { %v1447_v38 = vadd.f32 %v2161_v23, %v1309_v16 }
 0x1a3   :  { %v1555_v36 = vadd.f32 %v2196_v60, %v1447_v38 }
 0x1ba   :  { %v2264_v42 = vpop.f32.mrb[10].mxu1 }
 0x1bb   :  { %v2265_v1 = vpop.f32.mrb[11].mxu1 }
 0x1bc   :  { %v2266_v55 = vadd.f32 %v2265_v1, %v2264_v42 }
 0x1bd   :  { %v2229_v4 = vpop.f32.mrb[10].mxu0 }
 0x1be   :  { %v2230_v26 = vpop.f32.mrb[11].mxu0 }
 0x1bf   :  { %v2231_v50 = vadd.f32 %v2230_v26, %v2229_v4 }
 0x1c1   :  { %v1723_v47 = vadd.f32 %v2231_v50, %v1555_v36 }
 0x1c3   :  { %v1827_v3 = vadd.f32 %v2266_v55, %v1723_v47 }
 0x1c5   :  { %v1830_v28 = vadd.f32 %v1827_v3, %v18_v30 }
 0x1c7   :  { %1832 = vst.msk [vmem:[#allocation2] sm:$0x3] %vm16_vm0, %v1830_v28 }
 0x1c8   :  { %2666 = shalt.err (!%p2663_p4)
}
 0x1c9   :  { %s2667_s28 = scalar_lea.hbm %s4064_s2, 32 }
 0x1ca   :  { %p2668_p5 = scmp.ne.s32.totalorder %s4064_s2, %s2667_s28  ;;  %p2671_p6 = scmp.lt.u32.totalorder %s2667_s28, %s4064_s2 }
 0x1cc   :  { %p2673_p7 = pnand %p2671_p6, %p2668_p5 }
 0x1ce   :  { %2676 = shalt.err (!%p2673_p7)
}
 0x1cf   :  { %1842 = dma.vmem_to_hbm [thread:$0]  %s1840_s24, 32, %s4064_s2, [#allocation3]  }
 0x1d0   :  { %2677 = dma.done.wait [#allocation3], 32  }
 0x1d1   :  { %2678 = vsyncadd [#allocation3], 4294967264 }
 0x1d2   :  { %1846 = vsyncpa [#allocation3], 1 }

</bundles_post_ra>
